<compile_context>
chip_gen: v6e
topology: v6e:2x2x1
jax: 0.10.0
libtpu: 0.0.40
codegen_flags: <defaults>
</compile_context>

<pallas_src>
import jax
import jax.numpy as jnp
import numpy as np
from jax.experimental import pallas as pl
from jax.experimental.pallas import tpu as pltpu


# ----------------------------- Pallas kernel ------------------------------ #
def _make_kernel(B, T, H, G, Z):
    GZ = G * Z

    def kernel(x_ref, wih_ref, whh_ref, b_ref, whead_ref, bhead_ref,
               pi_ref, mu_ref, sigma_ref, h_out_ref, c_out_ref,
               h_all):
        # Small fused weights: load once into vregs.
        wih = wih_ref[...]         # (Z, 4H)
        whh = whh_ref[...]         # (H, 4H)
        bias = b_ref[...]          # (1, 4H)

        # ---------------- LSTM recurrence (sequential over T) ------------- #
        def step(t, carry):
            h_prev, c_prev = carry
            x_t = x_ref[t]         # (B, Z)  time-major input
            gates = (jnp.dot(x_t, wih, preferred_element_type=jnp.float32)
                     + jnp.dot(h_prev, whh, preferred_element_type=jnp.float32)
                     + bias)       # (B, 4H) — exactly one 128-lane tile
            # PyTorch LSTM gate order: i, f, g, o (static lane slices).
            i_g = jax.nn.sigmoid(gates[:, 0 * H:1 * H])
            f_g = jax.nn.sigmoid(gates[:, 1 * H:2 * H])
            g_g = jnp.tanh(gates[:, 2 * H:3 * H])
            o_g = jax.nn.sigmoid(gates[:, 3 * H:4 * H])
            c_new = f_g * c_prev + i_g * g_g
            h_new = o_g * jnp.tanh(c_new)
            h_all[t] = h_new       # keep every h_t for the batched MDN heads
            return (h_new, c_new)

        h0 = jnp.zeros((B, H), jnp.float32)   # (h_0, c_0) = zeros, as in PyTorch
        c0 = jnp.zeros((B, H), jnp.float32)
        h_T, c_T = jax.lax.fori_loop(0, T, step, (h0, c0), unroll=True)

        h_out_ref[0] = h_T         # (n_layers=1, B, H)
        c_out_ref[0] = c_T

        # -------- MDN heads, batched over all T time steps at once -------- #
        whead = whead_ref[...]     # (H, 3*G*Z)
        bhead = bhead_ref[...]     # (1, 3*G*Z)
        h_seq = h_all[...]         # (T, B, H)

        for b_idx in range(B):     # B is tiny and static — unrolled
            h_b = h_seq[:, b_idx, :]                       # (T, H)
            heads = (jnp.dot(h_b, whead, preferred_element_type=jnp.float32)
                     + bhead)                              # (T, 3*G*Z) lane-dense
            pi_logits = heads[:, 0:GZ]
            mu_b = heads[:, GZ:2 * GZ]
            ls_b = heads[:, 2 * GZ:3 * GZ]

            # Softmax over the Gaussian axis: groups of Z lanes, static slices.
            chunks = [pi_logits[:, g * Z:(g + 1) * Z] for g in range(G)]
            m = chunks[0]
            for g in range(1, G):
                m = jnp.maximum(m, chunks[g])
            exps = [jnp.exp(ch - m) for ch in chunks]
            denom = exps[0]
            for g in range(1, G):
                denom = denom + exps[g]
            inv = pl.reciprocal(denom, approx=True)        # EUP slot, VPU stays free
            pi_b = jnp.concatenate([e * inv for e in exps], axis=-1)  # (T, G*Z)

            # Lane-dense stores, already in (B, T, G*Z) batch-first order.
            pi_ref[b_idx] = pi_b
            mu_ref[b_idx] = mu_b
            sigma_ref[b_idx] = jnp.exp(ls_b)

    return kernel


# ------------------------------- Wrapper ----------------------------------- #
@jax.jit
def mdnrnn_forward(x, wih, whh, b, w1, b1, w2, b2, w3, b3):
    B, T, Z = x.shape
    H = wih.shape[2]
    G = w1.shape[0]
    GZ = G * Z

    # Fuse the 4 LSTM gates into a single (·, 4H) right-multiplication.
    wih_f = jnp.concatenate([wih[k] for k in range(4)], axis=1)   # (Z, 4H)
    whh_f = jnp.concatenate([whh[k] for k in range(4)], axis=1)   # (H, 4H)
    b_f = jnp.concatenate([b[k] for k in range(4)], axis=1)       # (1, 4H)

    # Fuse the 3 MDN heads (each per-gaussian) into one (H, 3*G*Z) matmul.
    def fuse_head(w, bb):
        wf = jnp.concatenate([w[g] for g in range(G)], axis=1)    # (H, G*Z)
        bf = jnp.concatenate([bb[g] for g in range(G)], axis=1)   # (1, G*Z)
        return wf, bf

    w1f, b1f = fuse_head(w1, b1)
    w2f, b2f = fuse_head(w2, b2)
    w3f, b3f = fuse_head(w3, b3)
    whead = jnp.concatenate([w1f, w2f, w3f], axis=1)              # (H, 3*G*Z)
    bhead = jnp.concatenate([b1f, b2f, b3f], axis=1)              # (1, 3*G*Z)

    x_tm = jnp.transpose(x, (1, 0, 2))                            # (T, B, Z)

    kernel = _make_kernel(B, T, H, G, Z)
    vmem = pltpu.MemorySpace.VMEM

    pi_f, mu_f, sig_f, h_out, c_out = pl.pallas_call(
        kernel,
        out_shape=(
            jax.ShapeDtypeStruct((B, T, GZ), jnp.float32),   # pi
            jax.ShapeDtypeStruct((B, T, GZ), jnp.float32),   # mu
            jax.ShapeDtypeStruct((B, T, GZ), jnp.float32),   # sigma
            jax.ShapeDtypeStruct((1, B, H), jnp.float32),    # h (n_layers=1)
            jax.ShapeDtypeStruct((1, B, H), jnp.float32),    # c
        ),
        in_specs=[pl.BlockSpec(memory_space=vmem)] * 6,
        out_specs=(pl.BlockSpec(memory_space=vmem),) * 5,
        scratch_shapes=[pltpu.VMEM((T, B, H), jnp.float32)],     # all h_t
    )(x_tm, wih_f, whh_f, b_f, whead, bhead)

    # Only a free last-dim split — already batch-first (B, T, G, Z).
    pi = pi_f.reshape(B, T, G, Z)
    mu = mu_f.reshape(B, T, G, Z)
    sigma = sig_f.reshape(B, T, G, Z)
    return (pi, mu, sigma), (h_out, c_out)


# --------------------------- Pure-JAX reference ---------------------------- #
def reference_forward(x, wih, whh, b, w1, b1, w2, b2, w3, b3):
    B, T, Z = x.shape
    H = wih.shape[2]

    def step(carry, x_t):
        h, c = carry
        i = jax.nn.sigmoid(x_t @ wih[0] + h @ whh[0] + b[0])
        f = jax.nn.sigmoid(x_t @ wih[1] + h @ whh[1] + b[1])
        g = jnp.tanh(x_t @ wih[2] + h @ whh[2] + b[2])
        o = jax.nn.sigmoid(x_t @ wih[3] + h @ whh[3] + b[3])
        c = f * c + i * g
        h = o * jnp.tanh(c)
        return (h, c), h

    init = (jnp.zeros((B, H), jnp.float32), jnp.zeros((B, H), jnp.float32))
    (h, c), ys = jax.lax.scan(step, init, jnp.transpose(x, (1, 0, 2)))
    y = jnp.transpose(ys, (1, 0, 2))  # (B, T, H)

    pi_l = jnp.einsum('bth,ghz->btgz', y, w1) + b1[:, 0][None, None]
    mu = jnp.einsum('bth,ghz->btgz', y, w2) + b2[:, 0][None, None]
    ls = jnp.einsum('bth,ghz->btgz', y, w3) + b3[:, 0][None, None]
    pi = jax.nn.softmax(pi_l, axis=2)
    sigma = jnp.exp(ls)
    return (pi, mu, sigma), (h[None], c[None])


# --------------------------------- Main ------------------------------------ #
if __name__ == "__main__":
    # Small shapes consistent with the module: z_size=32, hidden=32,
    # n_gaussians=5, n_layers=1, batch=2, seq=8.
    B, T, Z, H, G = 2, 8, 32, 32, 5

    key = jax.random.PRNGKey(0)
    ks = jax.random.split(key, 11)
    bound = 1.0 / np.sqrt(H)
    u = lambda k, shape: jax.random.uniform(k, shape, jnp.float32, -bound, bound)

    x = jax.random.normal(ks[0], (B, T, Z), jnp.float32)

    wih = u(ks[1], (4, Z, H))                      # input->gates (i,f,g,o)
    whh = u(ks[2], (4, H, H))                      # hidden->gates
    b = u(ks[3], (4, 1, H)) + u(ks[4], (4, 1, H))  # b_ih + b_hh

    w1 = u(ks[5], (G, H, Z))                       # fc1 (pi logits)
    b1 = u(ks[6], (G, 1, Z))
    w2 = u(ks[7], (G, H, Z))                       # fc2 (mu)
    b2 = u(ks[8], (G, 1, Z))
    w3 = u(ks[9], (G, H, Z))                       # fc3 (log_sigma)
    b3 = u(ks[10], (G, 1, Z))

    params = (wih, whh, b, w1, b1, w2, b2, w3, b3)

    (pi, mu, sigma), (h, c) = jax.block_until_ready(
        mdnrnn_forward(x, *params))

    (pi_r, mu_r, sig_r), (h_r, c_r) = reference_forward(x, *params)

    # pi uses the approximate EUP reciprocal -> slightly looser tolerance.
    np.testing.assert_allclose(np.asarray(pi), np.asarray(pi_r), rtol=5e-3, atol=5e-3)
    np.testing.assert_allclose(np.asarray(mu), np.asarray(mu_r), rtol=1e-4, atol=1e-4)
    np.testing.assert_allclose(np.asarray(sigma), np.asarray(sig_r), rtol=1e-4, atol=1e-4)
    np.testing.assert_allclose(np.asarray(h), np.asarray(h_r), rtol=1e-4, atol=1e-4)
    np.testing.assert_allclose(np.asarray(c), np.asarray(c_r), rtol=1e-4, atol=1e-4)

    # Sanity: pi sums to ~1 over the Gaussian axis.
    np.testing.assert_allclose(np.asarray(pi.sum(axis=2)),
                               np.ones((B, T, Z), np.float32), rtol=5e-3, atol=5e-3)

    print("KERNEL_OK")
</pallas_src>

<mosaic_0001>
module attributes {stable_mosaic.version = 11 : i64} {
  func.func @kernel(%arg0: memref<8x2x32xf32, #tpu.memory_space<vmem>>, %arg1: memref<32x128xf32, #tpu.memory_space<vmem>>, %arg2: memref<32x128xf32, #tpu.memory_space<vmem>>, %arg3: memref<1x128xf32, #tpu.memory_space<vmem>>, %arg4: memref<32x480xf32, #tpu.memory_space<vmem>>, %arg5: memref<1x480xf32, #tpu.memory_space<vmem>>, %arg6: memref<2x8x160xf32, #tpu.memory_space<vmem>>, %arg7: memref<2x8x160xf32, #tpu.memory_space<vmem>>, %arg8: memref<2x8x160xf32, #tpu.memory_space<vmem>>, %arg9: memref<1x2x32xf32, #tpu.memory_space<vmem>>, %arg10: memref<1x2x32xf32, #tpu.memory_space<vmem>>, %arg11: memref<8x2x32xf32, #tpu.memory_space<vmem>>) attributes {dimension_semantics = [], scalar_prefetch = 0 : i64, scratch_operands = 1 : i64, tpu.core_type = #tpu.core_type<tc>} {
    %c0 = arith.constant 0 : index
    %c0_0 = arith.constant 0 : index
    %0 = vector.load %arg1[%c0, %c0_0] : memref<32x128xf32, #tpu.memory_space<vmem>>, vector<32x128xf32>
    %c0_1 = arith.constant 0 : index
    %c0_2 = arith.constant 0 : index
    %1 = vector.load %arg2[%c0_1, %c0_2] : memref<32x128xf32, #tpu.memory_space<vmem>>, vector<32x128xf32>
    %c0_3 = arith.constant 0 : index
    %c0_4 = arith.constant 0 : index
    %2 = vector.load %arg3[%c0_3, %c0_4] : memref<1x128xf32, #tpu.memory_space<vmem>>, vector<1x128xf32>
    %cst = arith.constant 0.000000e+00 : f32
    %3 = vector.broadcast %cst : f32 to vector<2x32xf32>
    %cst_5 = arith.constant 0.000000e+00 : f32
    %4 = vector.broadcast %cst_5 : f32 to vector<2x32xf32>
    %c0_i32 = arith.constant 0 : i32
    %5 = arith.index_cast %c0_i32 : i32 to index
    %c0_6 = arith.constant 0 : index
    %c0_7 = arith.constant 0 : index
    %6 = vector.load %arg0[%5, %c0_6, %c0_7] : memref<8x2x32xf32, #tpu.memory_space<vmem>>, vector<1x2x32xf32>
    %7 = vector.shape_cast %6 : vector<1x2x32xf32> to vector<2x32xf32>
    %cst_8 = arith.constant dense<0.000000e+00> : vector<2x128xf32>
    %8 = tpu.matmul %7, %0, %cst_8 {dimension_numbers = #tpu.dot_dimension_numbers<[1], [0], [0], [1], [0, 0, 1, 1], [], []>} : vector<2x32xf32>, vector<32x128xf32>, vector<2x128xf32> -> vector<2x128xf32>
    %cst_9 = arith.constant dense<0.000000e+00> : vector<2x128xf32>
    %9 = tpu.matmul %3, %1, %cst_9 {dimension_numbers = #tpu.dot_dimension_numbers<[1], [0], [0], [1], [0, 0, 1, 1], [], []>} : vector<2x32xf32>, vector<32x128xf32>, vector<2x128xf32> -> vector<2x128xf32>
    %10 = arith.addf %8, %9 : vector<2x128xf32>
    %11 = vector.broadcast %2 : vector<1x128xf32> to vector<2x128xf32>
    %12 = arith.addf %10, %11 : vector<2x128xf32>
    %13 = vector.extract_strided_slice %12 {offsets = [0, 0], sizes = [2, 32], strides = [1, 1]} : vector<2x128xf32> to vector<2x32xf32>
    %14 = arith.negf %13 : vector<2x32xf32>
    %15 = math.exp %14 : vector<2x32xf32>
    %cst_10 = arith.constant 1.000000e+00 : f32
    %16 = vector.broadcast %cst_10 : f32 to vector<2x32xf32>
    %17 = arith.addf %16, %15 : vector<2x32xf32>
    %18 = arith.divf %16, %17 : vector<2x32xf32>
    %19 = vector.extract_strided_slice %12 {offsets = [0, 32], sizes = [2, 32], strides = [1, 1]} : vector<2x128xf32> to vector<2x32xf32>
    %20 = arith.negf %19 : vector<2x32xf32>
    %21 = math.exp %20 : vector<2x32xf32>
    %cst_11 = arith.constant 1.000000e+00 : f32
    %22 = vector.broadcast %cst_11 : f32 to vector<2x32xf32>
    %23 = arith.addf %22, %21 : vector<2x32xf32>
    %24 = arith.divf %22, %23 : vector<2x32xf32>
    %25 = vector.extract_strided_slice %12 {offsets = [0, 64], sizes = [2, 32], strides = [1, 1]} : vector<2x128xf32> to vector<2x32xf32>
    %26 = math.tanh %25 : vector<2x32xf32>
    %27 = vector.extract_strided_slice %12 {offsets = [0, 96], sizes = [2, 32], strides = [1, 1]} : vector<2x128xf32> to vector<2x32xf32>
    %28 = arith.negf %27 : vector<2x32xf32>
    %29 = math.exp %28 : vector<2x32xf32>
    %cst_12 = arith.constant 1.000000e+00 : f32
    %30 = vector.broadcast %cst_12 : f32 to vector<2x32xf32>
    %31 = arith.addf %30, %29 : vector<2x32xf32>
    %32 = arith.divf %30, %31 : vector<2x32xf32>
    %33 = arith.mulf %24, %4 : vector<2x32xf32>
    %34 = arith.mulf %18, %26 : vector<2x32xf32>
    %35 = arith.addf %33, %34 : vector<2x32xf32>
    %36 = math.tanh %35 : vector<2x32xf32>
    %37 = arith.mulf %32, %36 : vector<2x32xf32>
    %38 = arith.index_cast %c0_i32 : i32 to index
    %c0_13 = arith.constant 0 : index
    %c0_14 = arith.constant 0 : index
    %39 = vector.load %arg11[%38, %c0_13, %c0_14] : memref<8x2x32xf32, #tpu.memory_space<vmem>>, vector<1x2x32xf32>
    %40 = vector.shape_cast %39 : vector<1x2x32xf32> to vector<2x32xf32>
    %41 = vector.shape_cast %37 : vector<2x32xf32> to vector<1x2x32xf32>
    tpu.vector_store %arg11[%38, %c0_13, %c0_14], %41 {strides = array<i32>} : memref<8x2x32xf32, #tpu.memory_space<vmem>>, vector<1x2x32xf32>,
    %c1_i32 = arith.constant 1 : i32
    %42 = arith.index_cast %c1_i32 : i32 to index
    %c0_15 = arith.constant 0 : index
    %c0_16 = arith.constant 0 : index
    %43 = vector.load %arg0[%42, %c0_15, %c0_16] : memref<8x2x32xf32, #tpu.memory_space<vmem>>, vector<1x2x32xf32>
    %44 = vector.shape_cast %43 : vector<1x2x32xf32> to vector<2x32xf32>
    %cst_17 = arith.constant dense<0.000000e+00> : vector<2x128xf32>
    %45 = tpu.matmul %44, %0, %cst_17 {dimension_numbers = #tpu.dot_dimension_numbers<[1], [0], [0], [1], [0, 0, 1, 1], [], []>} : vector<2x32xf32>, vector<32x128xf32>, vector<2x128xf32> -> vector<2x128xf32>
    %cst_18 = arith.constant dense<0.000000e+00> : vector<2x128xf32>
    %46 = tpu.matmul %37, %1, %cst_18 {dimension_numbers = #tpu.dot_dimension_numbers<[1], [0], [0], [1], [0, 0, 1, 1], [], []>} : vector<2x32xf32>, vector<32x128xf32>, vector<2x128xf32> -> vector<2x128xf32>
    %47 = arith.addf %45, %46 : vector<2x128xf32>
    %48 = vector.broadcast %2 : vector<1x128xf32> to vector<2x128xf32>
    %49 = arith.addf %47, %48 : vector<2x128xf32>
    %50 = vector.extract_strided_slice %49 {offsets = [0, 0], sizes = [2, 32], strides = [1, 1]} : vector<2x128xf32> to vector<2x32xf32>
    %51 = arith.negf %50 : vector<2x32xf32>
    %52 = math.exp %51 : vector<2x32xf32>
    %cst_19 = arith.constant 1.000000e+00 : f32
    %53 = vector.broadcast %cst_19 : f32 to vector<2x32xf32>
    %54 = arith.addf %53, %52 : vector<2x32xf32>
    %55 = arith.divf %53, %54 : vector<2x32xf32>
    %56 = vector.extract_strided_slice %49 {offsets = [0, 32], sizes = [2, 32], strides = [1, 1]} : vector<2x128xf32> to vector<2x32xf32>
    %57 = arith.negf %56 : vector<2x32xf32>
    %58 = math.exp %57 : vector<2x32xf32>
    %cst_20 = arith.constant 1.000000e+00 : f32
    %59 = vector.broadcast %cst_20 : f32 to vector<2x32xf32>
    %60 = arith.addf %59, %58 : vector<2x32xf32>
    %61 = arith.divf %59, %60 : vector<2x32xf32>
    %62 = vector.extract_strided_slice %49 {offsets = [0, 64], sizes = [2, 32], strides = [1, 1]} : vector<2x128xf32> to vector<2x32xf32>
    %63 = math.tanh %62 : vector<2x32xf32>
    %64 = vector.extract_strided_slice %49 {offsets = [0, 96], sizes = [2, 32], strides = [1, 1]} : vector<2x128xf32> to vector<2x32xf32>
    %65 = arith.negf %64 : vector<2x32xf32>
    %66 = math.exp %65 : vector<2x32xf32>
    %cst_21 = arith.constant 1.000000e+00 : f32
    %67 = vector.broadcast %cst_21 : f32 to vector<2x32xf32>
    %68 = arith.addf %67, %66 : vector<2x32xf32>
    %69 = arith.divf %67, %68 : vector<2x32xf32>
    %70 = arith.mulf %61, %35 : vector<2x32xf32>
    %71 = arith.mulf %55, %63 : vector<2x32xf32>
    %72 = arith.addf %70, %71 : vector<2x32xf32>
    %73 = math.tanh %72 : vector<2x32xf32>
    %74 = arith.mulf %69, %73 : vector<2x32xf32>
    %75 = arith.index_cast %c1_i32 : i32 to index
    %c0_22 = arith.constant 0 : index
    %c0_23 = arith.constant 0 : index
    %76 = vector.load %arg11[%75, %c0_22, %c0_23] : memref<8x2x32xf32, #tpu.memory_space<vmem>>, vector<1x2x32xf32>
    %77 = vector.shape_cast %76 : vector<1x2x32xf32> to vector<2x32xf32>
    %78 = vector.shape_cast %74 : vector<2x32xf32> to vector<1x2x32xf32>
    tpu.vector_store %arg11[%75, %c0_22, %c0_23], %78 {strides = array<i32>} : memref<8x2x32xf32, #tpu.memory_space<vmem>>, vector<1x2x32xf32>,
    %c2_i32 = arith.constant 2 : i32
    %79 = arith.index_cast %c2_i32 : i32 to index
    %c0_24 = arith.constant 0 : index
    %c0_25 = arith.constant 0 : index
    %80 = vector.load %arg0[%79, %c0_24, %c0_25] : memref<8x2x32xf32, #tpu.memory_space<vmem>>, vector<1x2x32xf32>
    %81 = vector.shape_cast %80 : vector<1x2x32xf32> to vector<2x32xf32>
    %cst_26 = arith.constant dense<0.000000e+00> : vector<2x128xf32>
    %82 = tpu.matmul %81, %0, %cst_26 {dimension_numbers = #tpu.dot_dimension_numbers<[1], [0], [0], [1], [0, 0, 1, 1], [], []>} : vector<2x32xf32>, vector<32x128xf32>, vector<2x128xf32> -> vector<2x128xf32>
    %cst_27 = arith.constant dense<0.000000e+00> : vector<2x128xf32>
    %83 = tpu.matmul %74, %1, %cst_27 {dimension_numbers = #tpu.dot_dimension_numbers<[1], [0], [0], [1], [0, 0, 1, 1], [], []>} : vector<2x32xf32>, vector<32x128xf32>, vector<2x128xf32> -> vector<2x128xf32>
    %84 = arith.addf %82, %83 : vector<2x128xf32>
    %85 = vector.broadcast %2 : vector<1x128xf32> to vector<2x128xf32>
    %86 = arith.addf %84, %85 : vector<2x128xf32>
    %87 = vector.extract_strided_slice %86 {offsets = [0, 0], sizes = [2, 32], strides = [1, 1]} : vector<2x128xf32> to vector<2x32xf32>
    %88 = arith.negf %87 : vector<2x32xf32>
    %89 = math.exp %88 : vector<2x32xf32>
    %cst_28 = arith.constant 1.000000e+00 : f32
    %90 = vector.broadcast %cst_28 : f32 to vector<2x32xf32>
    %91 = arith.addf %90, %89 : vector<2x32xf32>
    %92 = arith.divf %90, %91 : vector<2x32xf32>
    %93 = vector.extract_strided_slice %86 {offsets = [0, 32], sizes = [2, 32], strides = [1, 1]} : vector<2x128xf32> to vector<2x32xf32>
    %94 = arith.negf %93 : vector<2x32xf32>
    %95 = math.exp %94 : vector<2x32xf32>
    %cst_29 = arith.constant 1.000000e+00 : f32
    %96 = vector.broadcast %cst_29 : f32 to vector<2x32xf32>
    %97 = arith.addf %96, %95 : vector<2x32xf32>
    %98 = arith.divf %96, %97 : vector<2x32xf32>
    %99 = vector.extract_strided_slice %86 {offsets = [0, 64], sizes = [2, 32], strides = [1, 1]} : vector<2x128xf32> to vector<2x32xf32>
    %100 = math.tanh %99 : vector<2x32xf32>
    %101 = vector.extract_strided_slice %86 {offsets = [0, 96], sizes = [2, 32], strides = [1, 1]} : vector<2x128xf32> to vector<2x32xf32>
    %102 = arith.negf %101 : vector<2x32xf32>
    %103 = math.exp %102 : vector<2x32xf32>
    %cst_30 = arith.constant 1.000000e+00 : f32
    %104 = vector.broadcast %cst_30 : f32 to vector<2x32xf32>
    %105 = arith.addf %104, %103 : vector<2x32xf32>
    %106 = arith.divf %104, %105 : vector<2x32xf32>
    %107 = arith.mulf %98, %72 : vector<2x32xf32>
    %108 = arith.mulf %92, %100 : vector<2x32xf32>
    %109 = arith.addf %107, %108 : vector<2x32xf32>
    %110 = math.tanh %109 : vector<2x32xf32>
    %111 = arith.mulf %106, %110 : vector<2x32xf32>
    %112 = arith.index_cast %c2_i32 : i32 to index
    %c0_31 = arith.constant 0 : index
    %c0_32 = arith.constant 0 : index
    %113 = vector.load %arg11[%112, %c0_31, %c0_32] : memref<8x2x32xf32, #tpu.memory_space<vmem>>, vector<1x2x32xf32>
    %114 = vector.shape_cast %113 : vector<1x2x32xf32> to vector<2x32xf32>
    %115 = vector.shape_cast %111 : vector<2x32xf32> to vector<1x2x32xf32>
    tpu.vector_store %arg11[%112, %c0_31, %c0_32], %115 {strides = array<i32>} : memref<8x2x32xf32, #tpu.memory_space<vmem>>, vector<1x2x32xf32>,
    %c3_i32 = arith.constant 3 : i32
    %116 = arith.index_cast %c3_i32 : i32 to index
    %c0_33 = arith.constant 0 : index
    %c0_34 = arith.constant 0 : index
    %117 = vector.load %arg0[%116, %c0_33, %c0_34] : memref<8x2x32xf32, #tpu.memory_space<vmem>>, vector<1x2x32xf32>
    %118 = vector.shape_cast %117 : vector<1x2x32xf32> to vector<2x32xf32>
    %cst_35 = arith.constant dense<0.000000e+00> : vector<2x128xf32>
    %119 = tpu.matmul %118, %0, %cst_35 {dimension_numbers = #tpu.dot_dimension_numbers<[1], [0], [0], [1], [0, 0, 1, 1], [], []>} : vector<2x32xf32>, vector<32x128xf32>, vector<2x128xf32> -> vector<2x128xf32>
    %cst_36 = arith.constant dense<0.000000e+00> : vector<2x128xf32>
    %120 = tpu.matmul %111, %1, %cst_36 {dimension_numbers = #tpu.dot_dimension_numbers<[1], [0], [0], [1], [0, 0, 1, 1], [], []>} : vector<2x32xf32>, vector<32x128xf32>, vector<2x128xf32> -> vector<2x128xf32>
    %121 = arith.addf %119, %120 : vector<2x128xf32>
    %122 = vector.broadcast %2 : vector<1x128xf32> to vector<2x128xf32>
    %123 = arith.addf %121, %122 : vector<2x128xf32>
    %124 = vector.extract_strided_slice %123 {offsets = [0, 0], sizes = [2, 32], strides = [1, 1]} : vector<2x128xf32> to vector<2x32xf32>
    %125 = arith.negf %124 : vector<2x32xf32>
    %126 = math.exp %125 : vector<2x32xf32>
    %cst_37 = arith.constant 1.000000e+00 : f32
    %127 = vector.broadcast %cst_37 : f32 to vector<2x32xf32>
    %128 = arith.addf %127, %126 : vector<2x32xf32>
    %129 = arith.divf %127, %128 : vector<2x32xf32>
    %130 = vector.extract_strided_slice %123 {offsets = [0, 32], sizes = [2, 32], strides = [1, 1]} : vector<2x128xf32> to vector<2x32xf32>
    %131 = arith.negf %130 : vector<2x32xf32>
    %132 = math.exp %131 : vector<2x32xf32>
    %cst_38 = arith.constant 1.000000e+00 : f32
    %133 = vector.broadcast %cst_38 : f32 to vector<2x32xf32>
    %134 = arith.addf %133, %132 : vector<2x32xf32>
    %135 = arith.divf %133, %134 : vector<2x32xf32>
    %136 = vector.extract_strided_slice %123 {offsets = [0, 64], sizes = [2, 32], strides = [1, 1]} : vector<2x128xf32> to vector<2x32xf32>
    %137 = math.tanh %136 : vector<2x32xf32>
    %138 = vector.extract_strided_slice %123 {offsets = [0, 96], sizes = [2, 32], strides = [1, 1]} : vector<2x128xf32> to vector<2x32xf32>
    %139 = arith.negf %138 : vector<2x32xf32>
    %140 = math.exp %139 : vector<2x32xf32>
    %cst_39 = arith.constant 1.000000e+00 : f32
    %141 = vector.broadcast %cst_39 : f32 to vector<2x32xf32>
    %142 = arith.addf %141, %140 : vector<2x32xf32>
    %143 = arith.divf %141, %142 : vector<2x32xf32>
    %144 = arith.mulf %135, %109 : vector<2x32xf32>
    %145 = arith.mulf %129, %137 : vector<2x32xf32>
    %146 = arith.addf %144, %145 : vector<2x32xf32>
    %147 = math.tanh %146 : vector<2x32xf32>
    %148 = arith.mulf %143, %147 : vector<2x32xf32>
    %149 = arith.index_cast %c3_i32 : i32 to index
    %c0_40 = arith.constant 0 : index
    %c0_41 = arith.constant 0 : index
    %150 = vector.load %arg11[%149, %c0_40, %c0_41] : memref<8x2x32xf32, #tpu.memory_space<vmem>>, vector<1x2x32xf32>
    %151 = vector.shape_cast %150 : vector<1x2x32xf32> to vector<2x32xf32>
    %152 = vector.shape_cast %148 : vector<2x32xf32> to vector<1x2x32xf32>
    tpu.vector_store %arg11[%149, %c0_40, %c0_41], %152 {strides = array<i32>} : memref<8x2x32xf32, #tpu.memory_space<vmem>>, vector<1x2x32xf32>,
    %c4_i32 = arith.constant 4 : i32
    %153 = arith.index_cast %c4_i32 : i32 to index
    %c0_42 = arith.constant 0 : index
    %c0_43 = arith.constant 0 : index
    %154 = vector.load %arg0[%153, %c0_42, %c0_43] : memref<8x2x32xf32, #tpu.memory_space<vmem>>, vector<1x2x32xf32>
    %155 = vector.shape_cast %154 : vector<1x2x32xf32> to vector<2x32xf32>
    %cst_44 = arith.constant dense<0.000000e+00> : vector<2x128xf32>
    %156 = tpu.matmul %155, %0, %cst_44 {dimension_numbers = #tpu.dot_dimension_numbers<[1], [0], [0], [1], [0, 0, 1, 1], [], []>} : vector<2x32xf32>, vector<32x128xf32>, vector<2x128xf32> -> vector<2x128xf32>
    %cst_45 = arith.constant dense<0.000000e+00> : vector<2x128xf32>
    %157 = tpu.matmul %148, %1, %cst_45 {dimension_numbers = #tpu.dot_dimension_numbers<[1], [0], [0], [1], [0, 0, 1, 1], [], []>} : vector<2x32xf32>, vector<32x128xf32>, vector<2x128xf32> -> vector<2x128xf32>
    %158 = arith.addf %156, %157 : vector<2x128xf32>
    %159 = vector.broadcast %2 : vector<1x128xf32> to vector<2x128xf32>
    %160 = arith.addf %158, %159 : vector<2x128xf32>
    %161 = vector.extract_strided_slice %160 {offsets = [0, 0], sizes = [2, 32], strides = [1, 1]} : vector<2x128xf32> to vector<2x32xf32>
    %162 = arith.negf %161 : vector<2x32xf32>
    %163 = math.exp %162 : vector<2x32xf32>
    %cst_46 = arith.constant 1.000000e+00 : f32
    %164 = vector.broadcast %cst_46 : f32 to vector<2x32xf32>
    %165 = arith.addf %164, %163 : vector<2x32xf32>
    %166 = arith.divf %164, %165 : vector<2x32xf32>
    %167 = vector.extract_strided_slice %160 {offsets = [0, 32], sizes = [2, 32], strides = [1, 1]} : vector<2x128xf32> to vector<2x32xf32>
    %168 = arith.negf %167 : vector<2x32xf32>
    %169 = math.exp %168 : vector<2x32xf32>
    %cst_47 = arith.constant 1.000000e+00 : f32
    %170 = vector.broadcast %cst_47 : f32 to vector<2x32xf32>
    %171 = arith.addf %170, %169 : vector<2x32xf32>
    %172 = arith.divf %170, %171 : vector<2x32xf32>
    %173 = vector.extract_strided_slice %160 {offsets = [0, 64], sizes = [2, 32], strides = [1, 1]} : vector<2x128xf32> to vector<2x32xf32>
    %174 = math.tanh %173 : vector<2x32xf32>
    %175 = vector.extract_strided_slice %160 {offsets = [0, 96], sizes = [2, 32], strides = [1, 1]} : vector<2x128xf32> to vector<2x32xf32>
    %176 = arith.negf %175 : vector<2x32xf32>
    %177 = math.exp %176 : vector<2x32xf32>
    %cst_48 = arith.constant 1.000000e+00 : f32
    %178 = vector.broadcast %cst_48 : f32 to vector<2x32xf32>
    %179 = arith.addf %178, %177 : vector<2x32xf32>
    %180 = arith.divf %178, %179 : vector<2x32xf32>
    %181 = arith.mulf %172, %146 : vector<2x32xf32>
    %182 = arith.mulf %166, %174 : vector<2x32xf32>
    %183 = arith.addf %181, %182 : vector<2x32xf32>
    %184 = math.tanh %183 : vector<2x32xf32>
    %185 = arith.mulf %180, %184 : vector<2x32xf32>
    %186 = arith.index_cast %c4_i32 : i32 to index
    %c0_49 = arith.constant 0 : index
    %c0_50 = arith.constant 0 : index
    %187 = vector.load %arg11[%186, %c0_49, %c0_50] : memref<8x2x32xf32, #tpu.memory_space<vmem>>, vector<1x2x32xf32>
    %188 = vector.shape_cast %187 : vector<1x2x32xf32> to vector<2x32xf32>
    %189 = vector.shape_cast %185 : vector<2x32xf32> to vector<1x2x32xf32>
    tpu.vector_store %arg11[%186, %c0_49, %c0_50], %189 {strides = array<i32>} : memref<8x2x32xf32, #tpu.memory_space<vmem>>, vector<1x2x32xf32>,
    %c5_i32 = arith.constant 5 : i32
    %190 = arith.index_cast %c5_i32 : i32 to index
    %c0_51 = arith.constant 0 : index
    %c0_52 = arith.constant 0 : index
    %191 = vector.load %arg0[%190, %c0_51, %c0_52] : memref<8x2x32xf32, #tpu.memory_space<vmem>>, vector<1x2x32xf32>
    %192 = vector.shape_cast %191 : vector<1x2x32xf32> to vector<2x32xf32>
    %cst_53 = arith.constant dense<0.000000e+00> : vector<2x128xf32>
    %193 = tpu.matmul %192, %0, %cst_53 {dimension_numbers = #tpu.dot_dimension_numbers<[1], [0], [0], [1], [0, 0, 1, 1], [], []>} : vector<2x32xf32>, vector<32x128xf32>, vector<2x128xf32> -> vector<2x128xf32>
    %cst_54 = arith.constant dense<0.000000e+00> : vector<2x128xf32>
    %194 = tpu.matmul %185, %1, %cst_54 {dimension_numbers = #tpu.dot_dimension_numbers<[1], [0], [0], [1], [0, 0, 1, 1], [], []>} : vector<2x32xf32>, vector<32x128xf32>, vector<2x128xf32> -> vector<2x128xf32>
    %195 = arith.addf %193, %194 : vector<2x128xf32>
    %196 = vector.broadcast %2 : vector<1x128xf32> to vector<2x128xf32>
    %197 = arith.addf %195, %196 : vector<2x128xf32>
    %198 = vector.extract_strided_slice %197 {offsets = [0, 0], sizes = [2, 32], strides = [1, 1]} : vector<2x128xf32> to vector<2x32xf32>
    %199 = arith.negf %198 : vector<2x32xf32>
    %200 = math.exp %199 : vector<2x32xf32>
    %cst_55 = arith.constant 1.000000e+00 : f32
    %201 = vector.broadcast %cst_55 : f32 to vector<2x32xf32>
    %202 = arith.addf %201, %200 : vector<2x32xf32>
    %203 = arith.divf %201, %202 : vector<2x32xf32>
    %204 = vector.extract_strided_slice %197 {offsets = [0, 32], sizes = [2, 32], strides = [1, 1]} : vector<2x128xf32> to vector<2x32xf32>
    %205 = arith.negf %204 : vector<2x32xf32>
    %206 = math.exp %205 : vector<2x32xf32>
    %cst_56 = arith.constant 1.000000e+00 : f32
    %207 = vector.broadcast %cst_56 : f32 to vector<2x32xf32>
    %208 = arith.addf %207, %206 : vector<2x32xf32>
    %209 = arith.divf %207, %208 : vector<2x32xf32>
    %210 = vector.extract_strided_slice %197 {offsets = [0, 64], sizes = [2, 32], strides = [1, 1]} : vector<2x128xf32> to vector<2x32xf32>
    %211 = math.tanh %210 : vector<2x32xf32>
    %212 = vector.extract_strided_slice %197 {offsets = [0, 96], sizes = [2, 32], strides = [1, 1]} : vector<2x128xf32> to vector<2x32xf32>
    %213 = arith.negf %212 : vector<2x32xf32>
    %214 = math.exp %213 : vector<2x32xf32>
    %cst_57 = arith.constant 1.000000e+00 : f32
    %215 = vector.broadcast %cst_57 : f32 to vector<2x32xf32>
    %216 = arith.addf %215, %214 : vector<2x32xf32>
    %217 = arith.divf %215, %216 : vector<2x32xf32>
    %218 = arith.mulf %209, %183 : vector<2x32xf32>
    %219 = arith.mulf %203, %211 : vector<2x32xf32>
    %220 = arith.addf %218, %219 : vector<2x32xf32>
    %221 = math.tanh %220 : vector<2x32xf32>
    %222 = arith.mulf %217, %221 : vector<2x32xf32>
    %223 = arith.index_cast %c5_i32 : i32 to index
    %c0_58 = arith.constant 0 : index
    %c0_59 = arith.constant 0 : index
    %224 = vector.load %arg11[%223, %c0_58, %c0_59] : memref<8x2x32xf32, #tpu.memory_space<vmem>>, vector<1x2x32xf32>
    %225 = vector.shape_cast %224 : vector<1x2x32xf32> to vector<2x32xf32>
    %226 = vector.shape_cast %222 : vector<2x32xf32> to vector<1x2x32xf32>
    tpu.vector_store %arg11[%223, %c0_58, %c0_59], %226 {strides = array<i32>} : memref<8x2x32xf32, #tpu.memory_space<vmem>>, vector<1x2x32xf32>,
    %c6_i32 = arith.constant 6 : i32
    %227 = arith.index_cast %c6_i32 : i32 to index
    %c0_60 = arith.constant 0 : index
    %c0_61 = arith.constant 0 : index
    %228 = vector.load %arg0[%227, %c0_60, %c0_61] : memref<8x2x32xf32, #tpu.memory_space<vmem>>, vector<1x2x32xf32>
    %229 = vector.shape_cast %228 : vector<1x2x32xf32> to vector<2x32xf32>
    %cst_62 = arith.constant dense<0.000000e+00> : vector<2x128xf32>
    %230 = tpu.matmul %229, %0, %cst_62 {dimension_numbers = #tpu.dot_dimension_numbers<[1], [0], [0], [1], [0, 0, 1, 1], [], []>} : vector<2x32xf32>, vector<32x128xf32>, vector<2x128xf32> -> vector<2x128xf32>
    %cst_63 = arith.constant dense<0.000000e+00> : vector<2x128xf32>
    %231 = tpu.matmul %222, %1, %cst_63 {dimension_numbers = #tpu.dot_dimension_numbers<[1], [0], [0], [1], [0, 0, 1, 1], [], []>} : vector<2x32xf32>, vector<32x128xf32>, vector<2x128xf32> -> vector<2x128xf32>
    %232 = arith.addf %230, %231 : vector<2x128xf32>
    %233 = vector.broadcast %2 : vector<1x128xf32> to vector<2x128xf32>
    %234 = arith.addf %232, %233 : vector<2x128xf32>
    %235 = vector.extract_strided_slice %234 {offsets = [0, 0], sizes = [2, 32], strides = [1, 1]} : vector<2x128xf32> to vector<2x32xf32>
    %236 = arith.negf %235 : vector<2x32xf32>
    %237 = math.exp %236 : vector<2x32xf32>
    %cst_64 = arith.constant 1.000000e+00 : f32
    %238 = vector.broadcast %cst_64 : f32 to vector<2x32xf32>
    %239 = arith.addf %238, %237 : vector<2x32xf32>
    %240 = arith.divf %238, %239 : vector<2x32xf32>
    %241 = vector.extract_strided_slice %234 {offsets = [0, 32], sizes = [2, 32], strides = [1, 1]} : vector<2x128xf32> to vector<2x32xf32>
    %242 = arith.negf %241 : vector<2x32xf32>
    %243 = math.exp %242 : vector<2x32xf32>
    %cst_65 = arith.constant 1.000000e+00 : f32
    %244 = vector.broadcast %cst_65 : f32 to vector<2x32xf32>
    %245 = arith.addf %244, %243 : vector<2x32xf32>
    %246 = arith.divf %244, %245 : vector<2x32xf32>
    %247 = vector.extract_strided_slice %234 {offsets = [0, 64], sizes = [2, 32], strides = [1, 1]} : vector<2x128xf32> to vector<2x32xf32>
    %248 = math.tanh %247 : vector<2x32xf32>
    %249 = vector.extract_strided_slice %234 {offsets = [0, 96], sizes = [2, 32], strides = [1, 1]} : vector<2x128xf32> to vector<2x32xf32>
    %250 = arith.negf %249 : vector<2x32xf32>
    %251 = math.exp %250 : vector<2x32xf32>
    %cst_66 = arith.constant 1.000000e+00 : f32
    %252 = vector.broadcast %cst_66 : f32 to vector<2x32xf32>
    %253 = arith.addf %252, %251 : vector<2x32xf32>
    %254 = arith.divf %252, %253 : vector<2x32xf32>
    %255 = arith.mulf %246, %220 : vector<2x32xf32>
    %256 = arith.mulf %240, %248 : vector<2x32xf32>
    %257 = arith.addf %255, %256 : vector<2x32xf32>
    %258 = math.tanh %257 : vector<2x32xf32>
    %259 = arith.mulf %254, %258 : vector<2x32xf32>
    %260 = arith.index_cast %c6_i32 : i32 to index
    %c0_67 = arith.constant 0 : index
    %c0_68 = arith.constant 0 : index
    %261 = vector.load %arg11[%260, %c0_67, %c0_68] : memref<8x2x32xf32, #tpu.memory_space<vmem>>, vector<1x2x32xf32>
    %262 = vector.shape_cast %261 : vector<1x2x32xf32> to vector<2x32xf32>
    %263 = vector.shape_cast %259 : vector<2x32xf32> to vector<1x2x32xf32>
    tpu.vector_store %arg11[%260, %c0_67, %c0_68], %263 {strides = array<i32>} : memref<8x2x32xf32, #tpu.memory_space<vmem>>, vector<1x2x32xf32>,
    %c7_i32 = arith.constant 7 : i32
    %264 = arith.index_cast %c7_i32 : i32 to index
    %c0_69 = arith.constant 0 : index
    %c0_70 = arith.constant 0 : index
    %265 = vector.load %arg0[%264, %c0_69, %c0_70] : memref<8x2x32xf32, #tpu.memory_space<vmem>>, vector<1x2x32xf32>
    %266 = vector.shape_cast %265 : vector<1x2x32xf32> to vector<2x32xf32>
    %cst_71 = arith.constant dense<0.000000e+00> : vector<2x128xf32>
    %267 = tpu.matmul %266, %0, %cst_71 {dimension_numbers = #tpu.dot_dimension_numbers<[1], [0], [0], [1], [0, 0, 1, 1], [], []>} : vector<2x32xf32>, vector<32x128xf32>, vector<2x128xf32> -> vector<2x128xf32>
    %cst_72 = arith.constant dense<0.000000e+00> : vector<2x128xf32>
    %268 = tpu.matmul %259, %1, %cst_72 {dimension_numbers = #tpu.dot_dimension_numbers<[1], [0], [0], [1], [0, 0, 1, 1], [], []>} : vector<2x32xf32>, vector<32x128xf32>, vector<2x128xf32> -> vector<2x128xf32>
    %269 = arith.addf %267, %268 : vector<2x128xf32>
    %270 = vector.broadcast %2 : vector<1x128xf32> to vector<2x128xf32>
    %271 = arith.addf %269, %270 : vector<2x128xf32>
    %272 = vector.extract_strided_slice %271 {offsets = [0, 0], sizes = [2, 32], strides = [1, 1]} : vector<2x128xf32> to vector<2x32xf32>
    %273 = arith.negf %272 : vector<2x32xf32>
    %274 = math.exp %273 : vector<2x32xf32>
    %cst_73 = arith.constant 1.000000e+00 : f32
    %275 = vector.broadcast %cst_73 : f32 to vector<2x32xf32>
    %276 = arith.addf %275, %274 : vector<2x32xf32>
    %277 = arith.divf %275, %276 : vector<2x32xf32>
    %278 = vector.extract_strided_slice %271 {offsets = [0, 32], sizes = [2, 32], strides = [1, 1]} : vector<2x128xf32> to vector<2x32xf32>
    %279 = arith.negf %278 : vector<2x32xf32>
    %280 = math.exp %279 : vector<2x32xf32>
    %cst_74 = arith.constant 1.000000e+00 : f32
    %281 = vector.broadcast %cst_74 : f32 to vector<2x32xf32>
    %282 = arith.addf %281, %280 : vector<2x32xf32>
    %283 = arith.divf %281, %282 : vector<2x32xf32>
    %284 = vector.extract_strided_slice %271 {offsets = [0, 64], sizes = [2, 32], strides = [1, 1]} : vector<2x128xf32> to vector<2x32xf32>
    %285 = math.tanh %284 : vector<2x32xf32>
    %286 = vector.extract_strided_slice %271 {offsets = [0, 96], sizes = [2, 32], strides = [1, 1]} : vector<2x128xf32> to vector<2x32xf32>
    %287 = arith.negf %286 : vector<2x32xf32>
    %288 = math.exp %287 : vector<2x32xf32>
    %cst_75 = arith.constant 1.000000e+00 : f32
    %289 = vector.broadcast %cst_75 : f32 to vector<2x32xf32>
    %290 = arith.addf %289, %288 : vector<2x32xf32>
    %291 = arith.divf %289, %290 : vector<2x32xf32>
    %292 = arith.mulf %283, %257 : vector<2x32xf32>
    %293 = arith.mulf %277, %285 : vector<2x32xf32>
    %294 = arith.addf %292, %293 : vector<2x32xf32>
    %295 = math.tanh %294 : vector<2x32xf32>
    %296 = arith.mulf %291, %295 : vector<2x32xf32>
    %297 = arith.index_cast %c7_i32 : i32 to index
    %c0_76 = arith.constant 0 : index
    %c0_77 = arith.constant 0 : index
    %298 = vector.load %arg11[%297, %c0_76, %c0_77] : memref<8x2x32xf32, #tpu.memory_space<vmem>>, vector<1x2x32xf32>
    %299 = vector.shape_cast %298 : vector<1x2x32xf32> to vector<2x32xf32>
    %300 = vector.shape_cast %296 : vector<2x32xf32> to vector<1x2x32xf32>
    tpu.vector_store %arg11[%297, %c0_76, %c0_77], %300 {strides = array<i32>} : memref<8x2x32xf32, #tpu.memory_space<vmem>>, vector<1x2x32xf32>,
    %c8_i32 = arith.constant 8 : i32
    %c0_78 = arith.constant 0 : index
    %c0_79 = arith.constant 0 : index
    %c0_80 = arith.constant 0 : index
    %301 = vector.load %arg9[%c0_78, %c0_79, %c0_80] : memref<1x2x32xf32, #tpu.memory_space<vmem>>, vector<1x2x32xf32>
    %302 = vector.shape_cast %301 : vector<1x2x32xf32> to vector<2x32xf32>
    %303 = vector.shape_cast %296 : vector<2x32xf32> to vector<1x2x32xf32>
    tpu.vector_store %arg9[%c0_78, %c0_79, %c0_80], %303 {strides = array<i32>} : memref<1x2x32xf32, #tpu.memory_space<vmem>>, vector<1x2x32xf32>,
    %c0_81 = arith.constant 0 : index
    %c0_82 = arith.constant 0 : index
    %c0_83 = arith.constant 0 : index
    %304 = vector.load %arg10[%c0_81, %c0_82, %c0_83] : memref<1x2x32xf32, #tpu.memory_space<vmem>>, vector<1x2x32xf32>
    %305 = vector.shape_cast %304 : vector<1x2x32xf32> to vector<2x32xf32>
    %306 = vector.shape_cast %294 : vector<2x32xf32> to vector<1x2x32xf32>
    tpu.vector_store %arg10[%c0_81, %c0_82, %c0_83], %306 {strides = array<i32>} : memref<1x2x32xf32, #tpu.memory_space<vmem>>, vector<1x2x32xf32>,
    %c0_84 = arith.constant 0 : index
    %c0_85 = arith.constant 0 : index
    %307 = vector.load %arg4[%c0_84, %c0_85] : memref<32x480xf32, #tpu.memory_space<vmem>>, vector<32x480xf32>
    %c0_86 = arith.constant 0 : index
    %c0_87 = arith.constant 0 : index
    %308 = vector.load %arg5[%c0_86, %c0_87] : memref<1x480xf32, #tpu.memory_space<vmem>>, vector<1x480xf32>
    %c0_88 = arith.constant 0 : index
    %c0_89 = arith.constant 0 : index
    %c0_90 = arith.constant 0 : index
    %309 = vector.load %arg11[%c0_88, %c0_89, %c0_90] : memref<8x2x32xf32, #tpu.memory_space<vmem>>, vector<8x2x32xf32>
    %310 = vector.extract_strided_slice %309 {offsets = [0, 0, 0], sizes = [8, 1, 32], strides = [1, 1, 1]} : vector<8x2x32xf32> to vector<8x1x32xf32>
    %311 = vector.shape_cast %310 : vector<8x1x32xf32> to vector<8x32xf32>
    %cst_91 = arith.constant dense<0.000000e+00> : vector<8x480xf32>
    %312 = tpu.matmul %311, %307, %cst_91 {dimension_numbers = #tpu.dot_dimension_numbers<[1], [0], [0], [1], [0, 0, 1, 1], [], []>} : vector<8x32xf32>, vector<32x480xf32>, vector<8x480xf32> -> vector<8x480xf32>
    %313 = vector.broadcast %308 : vector<1x480xf32> to vector<8x480xf32>
    %314 = arith.addf %312, %313 : vector<8x480xf32>
    %315 = vector.extract_strided_slice %314 {offsets = [0, 0], sizes = [8, 160], strides = [1, 1]} : vector<8x480xf32> to vector<8x160xf32>
    %316 = vector.extract_strided_slice %314 {offsets = [0, 160], sizes = [8, 160], strides = [1, 1]} : vector<8x480xf32> to vector<8x160xf32>
    %317 = vector.extract_strided_slice %314 {offsets = [0, 320], sizes = [8, 160], strides = [1, 1]} : vector<8x480xf32> to vector<8x160xf32>
    %318 = vector.extract_strided_slice %315 {offsets = [0, 0], sizes = [8, 32], strides = [1, 1]} : vector<8x160xf32> to vector<8x32xf32>
    %319 = vector.extract_strided_slice %315 {offsets = [0, 32], sizes = [8, 32], strides = [1, 1]} : vector<8x160xf32> to vector<8x32xf32>
    %320 = vector.extract_strided_slice %315 {offsets = [0, 64], sizes = [8, 32], strides = [1, 1]} : vector<8x160xf32> to vector<8x32xf32>
    %321 = vector.extract_strided_slice %315 {offsets = [0, 96], sizes = [8, 32], strides = [1, 1]} : vector<8x160xf32> to vector<8x32xf32>
    %322 = vector.extract_strided_slice %315 {offsets = [0, 128], sizes = [8, 32], strides = [1, 1]} : vector<8x160xf32> to vector<8x32xf32>
    %323 = arith.maximumf %318, %319 : vector<8x32xf32>
    %324 = arith.maximumf %323, %320 : vector<8x32xf32>
    %325 = arith.maximumf %324, %321 : vector<8x32xf32>
    %326 = arith.maximumf %325, %322 : vector<8x32xf32>
    %327 = arith.subf %318, %326 : vector<8x32xf32>
    %328 = math.exp %327 : vector<8x32xf32>
    %329 = arith.subf %319, %326 : vector<8x32xf32>
    %330 = math.exp %329 : vector<8x32xf32>
    %331 = arith.subf %320, %326 : vector<8x32xf32>
    %332 = math.exp %331 : vector<8x32xf32>
    %333 = arith.subf %321, %326 : vector<8x32xf32>
    %334 = math.exp %333 : vector<8x32xf32>
    %335 = arith.subf %322, %326 : vector<8x32xf32>
    %336 = math.exp %335 : vector<8x32xf32>
    %337 = arith.addf %328, %330 : vector<8x32xf32>
    %338 = arith.addf %337, %332 : vector<8x32xf32>
    %339 = arith.addf %338, %334 : vector<8x32xf32>
    %340 = arith.addf %339, %336 : vector<8x32xf32>
    %341 = tpu.reciprocal %340 {approx = true} : vector<8x32xf32> -> vector<8x32xf32>
    %342 = arith.mulf %328, %341 : vector<8x32xf32>
    %343 = arith.mulf %330, %341 : vector<8x32xf32>
    %344 = arith.mulf %332, %341 : vector<8x32xf32>
    %345 = arith.mulf %334, %341 : vector<8x32xf32>
    %346 = arith.mulf %336, %341 : vector<8x32xf32>
    %347 = tpu.concatenate %342, %343, %344, %345, %346 in 1 : vector<8x32xf32>, vector<8x32xf32>, vector<8x32xf32>, vector<8x32xf32>, vector<8x32xf32> -> vector<8x160xf32>
    %c0_92 = arith.constant 0 : index
    %c0_93 = arith.constant 0 : index
    %c0_94 = arith.constant 0 : index
    %348 = vector.load %arg6[%c0_92, %c0_93, %c0_94] : memref<2x8x160xf32, #tpu.memory_space<vmem>>, vector<1x8x160xf32>
    %349 = vector.shape_cast %348 : vector<1x8x160xf32> to vector<8x160xf32>
    %350 = vector.shape_cast %347 : vector<8x160xf32> to vector<1x8x160xf32>
    tpu.vector_store %arg6[%c0_92, %c0_93, %c0_94], %350 {strides = array<i32>} : memref<2x8x160xf32, #tpu.memory_space<vmem>>, vector<1x8x160xf32>,
    %c0_95 = arith.constant 0 : index
    %c0_96 = arith.constant 0 : index
    %c0_97 = arith.constant 0 : index
    %351 = vector.load %arg7[%c0_95, %c0_96, %c0_97] : memref<2x8x160xf32, #tpu.memory_space<vmem>>, vector<1x8x160xf32>
    %352 = vector.shape_cast %351 : vector<1x8x160xf32> to vector<8x160xf32>
    %353 = vector.shape_cast %316 : vector<8x160xf32> to vector<1x8x160xf32>
    tpu.vector_store %arg7[%c0_95, %c0_96, %c0_97], %353 {strides = array<i32>} : memref<2x8x160xf32, #tpu.memory_space<vmem>>, vector<1x8x160xf32>,
    %354 = math.exp %317 : vector<8x160xf32>
    %c0_98 = arith.constant 0 : index
    %c0_99 = arith.constant 0 : index
    %c0_100 = arith.constant 0 : index
    %355 = vector.load %arg8[%c0_98, %c0_99, %c0_100] : memref<2x8x160xf32, #tpu.memory_space<vmem>>, vector<1x8x160xf32>
    %356 = vector.shape_cast %355 : vector<1x8x160xf32> to vector<8x160xf32>
    %357 = vector.shape_cast %354 : vector<8x160xf32> to vector<1x8x160xf32>
    tpu.vector_store %arg8[%c0_98, %c0_99, %c0_100], %357 {strides = array<i32>} : memref<2x8x160xf32, #tpu.memory_space<vmem>>, vector<1x8x160xf32>,
    %358 = vector.extract_strided_slice %309 {offsets = [0, 1, 0], sizes = [8, 1, 32], strides = [1, 1, 1]} : vector<8x2x32xf32> to vector<8x1x32xf32>
    %359 = vector.shape_cast %358 : vector<8x1x32xf32> to vector<8x32xf32>
    %cst_101 = arith.constant dense<0.000000e+00> : vector<8x480xf32>
    %360 = tpu.matmul %359, %307, %cst_101 {dimension_numbers = #tpu.dot_dimension_numbers<[1], [0], [0], [1], [0, 0, 1, 1], [], []>} : vector<8x32xf32>, vector<32x480xf32>, vector<8x480xf32> -> vector<8x480xf32>
    %361 = vector.broadcast %308 : vector<1x480xf32> to vector<8x480xf32>
    %362 = arith.addf %360, %361 : vector<8x480xf32>
    %363 = vector.extract_strided_slice %362 {offsets = [0, 0], sizes = [8, 160], strides = [1, 1]} : vector<8x480xf32> to vector<8x160xf32>
    %364 = vector.extract_strided_slice %362 {offsets = [0, 160], sizes = [8, 160], strides = [1, 1]} : vector<8x480xf32> to vector<8x160xf32>
    %365 = vector.extract_strided_slice %362 {offsets = [0, 320], sizes = [8, 160], strides = [1, 1]} : vector<8x480xf32> to vector<8x160xf32>
    %366 = vector.extract_strided_slice %363 {offsets = [0, 0], sizes = [8, 32], strides = [1, 1]} : vector<8x160xf32> to vector<8x32xf32>
    %367 = vector.extract_strided_slice %363 {offsets = [0, 32], sizes = [8, 32], strides = [1, 1]} : vector<8x160xf32> to vector<8x32xf32>
    %368 = vector.extract_strided_slice %363 {offsets = [0, 64], sizes = [8, 32], strides = [1, 1]} : vector<8x160xf32> to vector<8x32xf32>
    %369 = vector.extract_strided_slice %363 {offsets = [0, 96], sizes = [8, 32], strides = [1, 1]} : vector<8x160xf32> to vector<8x32xf32>
    %370 = vector.extract_strided_slice %363 {offsets = [0, 128], sizes = [8, 32], strides = [1, 1]} : vector<8x160xf32> to vector<8x32xf32>
    %371 = arith.maximumf %366, %367 : vector<8x32xf32>
    %372 = arith.maximumf %371, %368 : vector<8x32xf32>
    %373 = arith.maximumf %372, %369 : vector<8x32xf32>
    %374 = arith.maximumf %373, %370 : vector<8x32xf32>
    %375 = arith.subf %366, %374 : vector<8x32xf32>
    %376 = math.exp %375 : vector<8x32xf32>
    %377 = arith.subf %367, %374 : vector<8x32xf32>
    %378 = math.exp %377 : vector<8x32xf32>
    %379 = arith.subf %368, %374 : vector<8x32xf32>
    %380 = math.exp %379 : vector<8x32xf32>
    %381 = arith.subf %369, %374 : vector<8x32xf32>
    %382 = math.exp %381 : vector<8x32xf32>
    %383 = arith.subf %370, %374 : vector<8x32xf32>
    %384 = math.exp %383 : vector<8x32xf32>
    %385 = arith.addf %376, %378 : vector<8x32xf32>
    %386 = arith.addf %385, %380 : vector<8x32xf32>
    %387 = arith.addf %386, %382 : vector<8x32xf32>
    %388 = arith.addf %387, %384 : vector<8x32xf32>
    %389 = tpu.reciprocal %388 {approx = true} : vector<8x32xf32> -> vector<8x32xf32>
    %390 = arith.mulf %376, %389 : vector<8x32xf32>
    %391 = arith.mulf %378, %389 : vector<8x32xf32>
    %392 = arith.mulf %380, %389 : vector<8x32xf32>
    %393 = arith.mulf %382, %389 : vector<8x32xf32>
    %394 = arith.mulf %384, %389 : vector<8x32xf32>
    %395 = tpu.concatenate %390, %391, %392, %393, %394 in 1 : vector<8x32xf32>, vector<8x32xf32>, vector<8x32xf32>, vector<8x32xf32>, vector<8x32xf32> -> vector<8x160xf32>
    %c1 = arith.constant 1 : index
    %c0_102 = arith.constant 0 : index
    %c0_103 = arith.constant 0 : index
    %396 = vector.load %arg6[%c1, %c0_102, %c0_103] : memref<2x8x160xf32, #tpu.memory_space<vmem>>, vector<1x8x160xf32>
    %397 = vector.shape_cast %396 : vector<1x8x160xf32> to vector<8x160xf32>
    %398 = vector.shape_cast %395 : vector<8x160xf32> to vector<1x8x160xf32>
    tpu.vector_store %arg6[%c1, %c0_102, %c0_103], %398 {strides = array<i32>} : memref<2x8x160xf32, #tpu.memory_space<vmem>>, vector<1x8x160xf32>,
    %c1_104 = arith.constant 1 : index
    %c0_105 = arith.constant 0 : index
    %c0_106 = arith.constant 0 : index
    %399 = vector.load %arg7[%c1_104, %c0_105, %c0_106] : memref<2x8x160xf32, #tpu.memory_space<vmem>>, vector<1x8x160xf32>
    %400 = vector.shape_cast %399 : vector<1x8x160xf32> to vector<8x160xf32>
    %401 = vector.shape_cast %364 : vector<8x160xf32> to vector<1x8x160xf32>
    tpu.vector_store %arg7[%c1_104, %c0_105, %c0_106], %401 {strides = array<i32>} : memref<2x8x160xf32, #tpu.memory_space<vmem>>, vector<1x8x160xf32>,
    %402 = math.exp %365 : vector<8x160xf32>
    %c1_107 = arith.constant 1 : index
    %c0_108 = arith.constant 0 : index
    %c0_109 = arith.constant 0 : index
    %403 = vector.load %arg8[%c1_107, %c0_108, %c0_109] : memref<2x8x160xf32, #tpu.memory_space<vmem>>, vector<1x8x160xf32>
    %404 = vector.shape_cast %403 : vector<1x8x160xf32> to vector<8x160xf32>
    %405 = vector.shape_cast %402 : vector<8x160xf32> to vector<1x8x160xf32>
    tpu.vector_store %arg8[%c1_107, %c0_108, %c0_109], %405 {strides = array<i32>} : memref<2x8x160xf32, #tpu.memory_space<vmem>>, vector<1x8x160xf32>,
    return
  }
}

</mosaic_0001>

<bundles_post_ra>
// kernel: mdnrnn_forward.1
= control target key start
LH: loop header
LB: loop body
LE: loop exit
PB: predicated region body
PF: predicated region fallthrough
CT: control target
= control target key end

     0   :  { %16 = vsyncpa [#allocation4], 0  ;;  %v2546_v2 = vmov 0.0   ;;  %s3211_s0 = inlined_call_operand.vmem [shape: f32[8,2,32], index: 0, kind: input, shape index: {}]   ;;  %s3212_s1 = inlined_call_operand.vmem [shape: f32[32,128], index: 1, kind: input, shape index: {}]   ;;  %s3213_s2 = inlined_call_operand.vmem [shape: f32[32,128], index: 2, kind: input, shape index: {}]   ;;  %s3214_s3 = inlined_call_operand.vmem [shape: f32[1,128], index: 3, kind: input, shape index: {}]   ;;  %s3215_s4 = inlined_call_operand.vmem [shape: f32[32,480], index: 4, kind: input, shape index: {}]   ;;  %s3216_s5 = inlined_call_operand.vmem [shape: f32[1,480], index: 5, kind: input, shape index: {}]   ;;  %s3217_s6 = inlined_call_operand.vmem [shape: f32[2,8,160], index: 6, kind: output, shape index: {0}]   ;;  %s3218_s7 = inlined_call_operand.vmem [shape: f32[2,8,160], index: 7, kind: output, shape index: {1}]   ;;  %s3219_s8 = inlined_call_operand.vmem [shape: f32[2,8,160], index: 8, kind: output, shape index: {2}]   ;;  %s3220_s9 = inlined_call_operand.hbm [shape: f32[1,2,32], index: 9, kind: output, shape index: {3}]   ;;  %s3221_s10 = inlined_call_operand.hbm [shape: f32[1,2,32], index: 10, kind: output, shape index: {4}]  }
   0x1   :  { %v2611_v0 = vld [vmem:[%s3213_s2 + $0x18] sm:$0xff]  ;;  %2223 = vmatprep.subr.mxu0 %v2546_v2  ;;  %2234 = vmatprep.subr.mxu1 %v2546_v2  ;;  %v2623_v3 = vld [vmem:[%s3213_s2 + $0x10] sm:$0xff]  ;;  %v2637_v5 = vld [vmem:[%s3213_s2 + $0x8] sm:$0xff] }
   0x2   :  { %v2616_v1 = vld [vmem:[%s3212_s1 + $0x18] sm:$0xff]  ;;  %v2628_v4 = vld [vmem:[%s3212_s1 + $0x10] sm:$0xff]  ;;  %2224 = vmatpush3.msra.mxu0 %v2611_v0  ;;  %v2642_v6 = vld [vmem:[%s3212_s1 + $0x8] sm:$0xff] }
   0x3   :  { %2235 = vmatpush3.msra.mxu1 %v2616_v1  ;;  %2225 = vmatprep.subr.mxu0 %v2546_v2 }
   0x4   :  { %2236 = vmatprep.subr.mxu1 %v2546_v2 }
   0x5   :  { %17 = vsyncpa [#allocation6], 0  ;;  %2226 = vmatpush3.msra.mxu0 %v2623_v3  ;;  %2237 = vmatpush3.msra.mxu1 %v2628_v4  ;;  %v2651_v7 = vld [vmem:[%s3213_s2] sm:$0xff]  ;;  %vm40_vm0 = vcmask 261120   ;;  %vm2547_vm1 = vmmov 0   ;;  %s2548_s11 = smov 64  }
   0x6   :  { %2227 = vmatprep.subr.mxu0 %v2546_v2  ;;  %2238 = vmatprep.subr.mxu1 %v2546_v2  ;;  %v2658_v8 = vld [vmem:[%s3212_s1] sm:$0xff]  ;;  %vm222_vm2 = vcmask 254976   ;;  %vm1534_vm3 = vcmask 1042434   ;;  %vm1531_vm4 = vcmask 1041409   ;;  %vm1537_vm5 = vcmask 1043459   ;;  %s2550_s15 = smov 96  }
   0x7   :  { %2228 = vmatpush3.msra.mxu0 %v2637_v5  ;;  %2239 = vmatpush3.msra.mxu1 %v2642_v6  ;;  %v39_v9 = vld [vmem:[%s3211_s0] sm:$0x3]  ;;  %v2105_v27 = vld [vmem:[%s3211_s0 + $0x2] sm:$0x3]  ;;  %v2109_v48 = vld [vmem:[%s3211_s0 + $0x4] sm:$0x3] }
   0x8   :  { %2229 = vmatprep.subr.mxu0 %v2546_v2  ;;  %2240 = vmatprep.subr.mxu1 %v2546_v2  ;;  %v2698_v11 = vld [vmem:[%s3214_s3] ss:$0 sm:$0xff]  ;;  %s2549_s3 = smov 32   ;;  %vm1540_vm6 = vcmask 1044484   ;;  %vm1543_vm7 = vcmask 1045509   ;;  %vm1546_vm8 = vcmask 1046534  }
   0x9   :  { %2230 = vmatpush3.msra.mxu0 %v2651_v7  ;;  %2231 = vmatprep.mubr.msk.f32.mxu0 %vm2547_vm1, %v2546_v2  ;;  %vm1549_vm9 = vcmask 1047559   ;;  %vm1769_vm10 = vcmask 785408   ;;  %vm1767_vm11 = vcmask 523264   ;;  %s2551_s28 = smov [#allocation3]   ;;  %s2552_s30 = smov [#allocation5]  }
   0xa   :  { %2241 = vmatpush3.msra.mxu1 %v2658_v8  ;;  %2242 = vmatprep.mubr.msk.f32.mxu1 %vm2547_vm1, %v2546_v2  ;;  %s2074_s29 = sshll.u32 %s2551_s28, 4  ;;  %s2084_s1 = sshll.u32 %s2552_s30, 4  ;;  %s2075_s29 = int_to_ptr.vmem [resolvable:$true] %s2074_s29  ;;  %s2085_s1 = int_to_ptr.vmem [resolvable:$true] %s2084_s1 }
   0xb   :  { %2232 = vmatmul.mubr.f32.vlgmr.msra.gmra.mxu0 %v2546_v2  ;;  %2243 = vmatmul.mubr.msk.f32.vlgmr.msra.gmra.mxu1 %vm40_vm0, %v39_v9  ;;  %s2502_s2 = scalar_lea.vmem %s2075_s29, 32  ;;  %p2507_p1 = scmp.lt.s32.totalorder %s2075_s29, %s2075_s29 }
   0xc   :  { %2256 = vmatprep.subr.mxu1 %v2546_v2  ;;  %2245 = vmatprep.subr.mxu0 %v2546_v2  ;;  %p2503_p0 = scmp.ne.s32.totalorder %s2075_s29, %s2502_s2  ;;  %p2508_p2 = scmp.lt.s32.totalorder %s2502_s2, %s2502_s2 }
   0xd   :  { %2257 = vmatpush3.msra.mxu1 %v2616_v1  ;;  %2246 = vmatpush3.msra.mxu0 %v2611_v0 }
   0xe   :  { %2258 = vmatprep.subr.mxu1 %v2546_v2  ;;  %2247 = vmatprep.subr.mxu0 %v2546_v2  ;;  %p2509_p3 = por %p2508_p2, %p2507_p1 }
   0xf   :  { %2259 = vmatpush3.msra.mxu1 %v2628_v4  ;;  %2248 = vmatpush3.msra.mxu0 %v2623_v3 }
  0x10   :  { %2260 = vmatprep.subr.mxu1 %v2546_v2  ;;  %2249 = vmatprep.subr.mxu0 %v2546_v2  ;;  %p2510_p4 = pnand %p2509_p3, %p2503_p0 }
  0x11   :  { %2261 = vmatpush3.msra.mxu1 %v2642_v6  ;;  %2250 = vmatpush3.msra.mxu0 %v2637_v5 }
  0x12   :  { %2262 = vmatprep.subr.mxu1 %v2546_v2  ;;  %2264 = vmatprep.mubr.msk.f32.mxu1 %vm2547_vm1, %v2546_v2 }
  0x13   :  { %2263 = vmatpush3.msra.mxu1 %v2658_v8  ;;  %2251 = vmatprep.subr.mxu0 %v2546_v2 }
  0x14   :  { %2252 = vmatpush3.msra.mxu0 %v2651_v7  ;;  %2253 = vmatprep.mubr.msk.f32.mxu0 %vm2547_vm1, %v2546_v2 }
  0x15   :  { %2278 = vmatprep.subr.mxu1 %v2546_v2  ;;  %2267 = vmatprep.subr.mxu0 %v2546_v2 }
  0x16   :  { %2265 = vmatmul.mubr.msk.f32.vlgmr.msra.gmra.mxu1 %vm40_vm0, %v2105_v27 }
  0x17   :  { %2279 = vmatpush3.msra.mxu1 %v2616_v1  ;;  %2286 = vmatprep.mubr.msk.f32.mxu1 %vm2547_vm1, %v2546_v2 }
  0x18   :  { %2280 = vmatprep.subr.mxu1 %v2546_v2 }
  0x19   :  { %2281 = vmatpush3.msra.mxu1 %v2628_v4 }
  0x1a   :  { %2282 = vmatprep.subr.mxu1 %v2546_v2 }
  0x1b   :  { %2283 = vmatpush3.msra.mxu1 %v2642_v6 }
  0x1c   :  { %2284 = vmatprep.subr.mxu1 %v2546_v2 }
  0x1d   :  { %2285 = vmatpush3.msra.mxu1 %v2658_v8 }
  0x1e   :  { %2300 = vmatprep.subr.mxu1 %v2546_v2  ;;  %2287 = vmatmul.mubr.msk.f32.vlgmr.msra.gmra.mxu1 %vm40_vm0, %v2109_v48 }
  0x1f   :  { %2301 = vmatpush3.msra.mxu1 %v2616_v1  ;;  %2308 = vmatprep.mubr.msk.f32.mxu1 %vm2547_vm1, %v2546_v2 }
  0x20   :  { %2302 = vmatprep.subr.mxu1 %v2546_v2 }
  0x21   :  { %2303 = vmatpush3.msra.mxu1 %v2628_v4 }
  0x22   :  { %2304 = vmatprep.subr.mxu1 %v2546_v2 }
  0x23   :  { %2305 = vmatpush3.msra.mxu1 %v2642_v6 }
  0x24   :  { %2306 = vmatprep.subr.mxu1 %v2546_v2 }
  0x25   :  { %2307 = vmatpush3.msra.mxu1 %v2658_v8 }
  0x26   :  { %2322 = vmatprep.subr.mxu1 %v2546_v2 }
  0xcb   :  { %v110_v10 = vpop.f32.mrf.mxu0  ;;  %v183_v12 = vpop.f32.mrf.mxu1 }
  0xcc   :  { %v184_v13 = vadd.f32 %v183_v12, %v110_v10 }
  0xcd   :  { %v2233_v14 = vpop.f32.mrf.mxu0  ;;  %v2244_v15 = vpop.f32.mrf.mxu1 }
  0xce   :  { %v193_v16 = vadd.f32 %v2698_v11, %v184_v13  ;;  %v2113_v15 = vld [vmem:[%s3211_s0 + $0x6] sm:$0x3] }
  0xcf   :  { %2309 = vmatmul.mubr.msk.f32.vlgmr.msra.gmra.mxu1 %vm40_vm0, %v2113_v15 }
  0xd0   :  { %2406 = vtanh.f32 %v193_v16  ;;  %v2104_v18 = vmul.f32 -1.442695, %v193_v16  ;;  %2323 = vmatpush3.msra.mxu1 %v2616_v1  ;;  %2330 = vmatprep.mubr.msk.f32.mxu1 %vm2547_vm1, %v2546_v2 }
  0xd1   :  { %2324 = vmatprep.subr.mxu1 %v2546_v2 }
  0xd2   :  { %2408 = vpow2.f32 %v2104_v18  ;;  %2325 = vmatpush3.msra.mxu1 %v2628_v4 }
  0xd3   :  { %2326 = vmatprep.subr.mxu1 %v2546_v2 }
  0xd4   :  { %2327 = vmatpush3.msra.mxu1 %v2642_v6 }
  0xd5   :  { %2328 = vmatprep.subr.mxu1 %v2546_v2 }
  0xd6   :  { %v367_v31 = vpop.f32.mrf.mxu1  ;;  %2329 = vmatpush3.msra.mxu1 %v2658_v8 }
  0xd7   :  { %2344 = vmatprep.subr.mxu1 %v2546_v2 }
  0xd8   :  { %v2266_v32 = vpop.f32.mrf.mxu1 }
  0xdd   :  { %v2407_v17 = vpop.eup %2406 }
  0xde   :  { %203 = vrot.lane.b32.xlu0 %v2407_v17, %s2548_s11  ;;  %v545_v52 = vpop.f32.mrf.mxu1 }
  0xdf   :  { %v2409_v19 = vpop.eup %2408 }
  0xe0   :  { %v197_v20 = vadd.f32 1.0, %v2409_v19  ;;  %v2288_v53 = vpop.f32.mrf.mxu1 }
  0xe2   :  { %2410 = vrcp.f32 %v197_v20 }
  0xef   :  { %v2411_v21 = vpop.eup %2410 }
  0xf0   :  { %v201_v24 = vmul.f32 0.0, %v2411_v21 }
 0x150   :  { %v204_v22 = vpop.permute.xlu0 %203 }
 0x151   :  { %v206_v23 = vmul.f32 %v2411_v21, %v204_v22 }
 0x153   :  { %208 = vrot.lane.b32.xlu0 %v206_v23, %s2549_s3 }
 0x18f   :  { %v723_v19 = vpop.f32.mrf.mxu1 }
 0x191   :  { %v2310_v20 = vpop.f32.mrf.mxu1 }
 0x1c5   :  { %v209_v25 = vpop.permute.xlu0 %208 }
 0x1c6   :  { %v211_v26 = vadd.f32 %v209_v25, %v201_v24 }
 0x1c8   :  { %2412 = vtanh.f32 %v211_v26 }
 0x1d5   :  { %v2413_v28 = vpop.eup %2412 }
 0x1d6   :  { %214 = vrot.lane.b32.xlu1 %v2413_v28, %s2548_s11 }
 0x248   :  { %v215_v29 = vpop.permute.xlu1 %214 }
 0x249   :  { %v217_v30 = vmul.f32 %v2411_v21, %v215_v29 }
 0x24b   :  { %219 = vrot.lane.b32.xlu1 %v217_v30, %s2549_s3 }
 0x2bd   :  { %v220_v33 = vpop.permute.xlu1 %219 }
 0x2be   :  { %223 = vst.msk [vmem:[#allocation2] sm:$0x3] %vm222_vm2, %v220_v33  ;;  %2254 = vmatmul.mubr.msk.f32.vlgmr.msra.gmra.mxu0 %vm40_vm0, %v220_v33 }
 0x2bf   :  { %2268 = vmatpush3.msra.mxu0 %v2611_v0  ;;  %2275 = vmatprep.mubr.msk.f32.mxu0 %vm2547_vm1, %v2546_v2 }
 0x2c0   :  { %2269 = vmatprep.subr.mxu0 %v2546_v2 }
 0x2c1   :  { %2270 = vmatpush3.msra.mxu0 %v2623_v3 }
 0x2c2   :  { %2271 = vmatprep.subr.mxu0 %v2546_v2 }
 0x2c3   :  { %2272 = vmatpush3.msra.mxu0 %v2637_v5 }
 0x2c4   :  { %2273 = vmatprep.subr.mxu0 %v2546_v2 }
 0x2c5   :  { %2274 = vmatpush3.msra.mxu0 %v2651_v7 }
 0x2c6   :  { %2289 = vmatprep.subr.mxu0 %v2546_v2 }
 0x37e   :  { %v294_v34 = vpop.f32.mrf.mxu0 }
 0x37f   :  { %v368_v35 = vadd.f32 %v367_v31, %v294_v34 }
 0x380   :  { %v2255_v36 = vpop.f32.mrf.mxu0 }
 0x381   :  { %v371_v37 = vadd.f32 %v2698_v11, %v368_v35  ;;  %v2117_v36 = vld [vmem:[%s3211_s0 + $0x8] sm:$0x3] }
 0x382   :  { %2331 = vmatmul.mubr.msk.f32.vlgmr.msra.gmra.mxu1 %vm40_vm0, %v2117_v36 }
 0x383   :  { %2414 = vtanh.f32 %v371_v37  ;;  %v2108_v39 = vmul.f32 -1.442695, %v371_v37  ;;  %2345 = vmatpush3.msra.mxu1 %v2616_v1  ;;  %2352 = vmatprep.mubr.msk.f32.mxu1 %vm2547_vm1, %v2546_v2 }
 0x384   :  { %2346 = vmatprep.subr.mxu1 %v2546_v2 }
 0x385   :  { %2416 = vpow2.f32 %v2108_v39  ;;  %2347 = vmatpush3.msra.mxu1 %v2628_v4 }
 0x386   :  { %2348 = vmatprep.subr.mxu1 %v2546_v2 }
 0x387   :  { %2349 = vmatpush3.msra.mxu1 %v2642_v6 }
 0x388   :  { %2350 = vmatprep.subr.mxu1 %v2546_v2 }
 0x389   :  { %2351 = vmatpush3.msra.mxu1 %v2658_v8 }
 0x38a   :  { %2366 = vmatprep.subr.mxu1 %v2546_v2 }
 0x390   :  { %v2415_v38 = vpop.eup %2414 }
 0x391   :  { %381 = vrot.lane.b32.xlu0 %v2415_v38, %s2548_s11 }
 0x392   :  { %v2417_v40 = vpop.eup %2416 }
 0x393   :  { %v375_v41 = vadd.f32 1.0, %v2417_v40 }
 0x395   :  { %2418 = vrcp.f32 %v375_v41 }
 0x3a2   :  { %v2419_v42 = vpop.eup %2418 }
 0x3a3   :  { %v379_v45 = vmul.f32 %v2419_v42, %v211_v26 }
 0x403   :  { %v382_v43 = vpop.permute.xlu0 %381 }
 0x404   :  { %v384_v44 = vmul.f32 %v2419_v42, %v382_v43 }
 0x406   :  { %386 = vrot.lane.b32.xlu1 %v384_v44, %s2549_s3 }
 0x442   :  { %v901_v40 = vpop.f32.mrf.mxu1 }
 0x444   :  { %v2332_v41 = vpop.f32.mrf.mxu1 }
 0x478   :  { %v387_v46 = vpop.permute.xlu1 %386 }
 0x479   :  { %v389_v47 = vadd.f32 %v387_v46, %v379_v45 }
 0x47b   :  { %2420 = vtanh.f32 %v389_v47 }
 0x488   :  { %v2421_v49 = vpop.eup %2420 }
 0x489   :  { %392 = vrot.lane.b32.xlu0 %v2421_v49, %s2548_s11 }
 0x4fb   :  { %v393_v50 = vpop.permute.xlu0 %392 }
 0x4fc   :  { %v395_v51 = vmul.f32 %v2419_v42, %v393_v50 }
 0x4fe   :  { %397 = vrot.lane.b32.xlu1 %v395_v51, %s2549_s3 }
 0x570   :  { %v398_v54 = vpop.permute.xlu1 %397 }
 0x571   :  { %401 = vst.msk [vmem:[#allocation2 + $0x2] sm:$0x3] %vm222_vm2, %v398_v54  ;;  %2276 = vmatmul.mubr.msk.f32.vlgmr.msra.gmra.mxu0 %vm40_vm0, %v398_v54 }
 0x572   :  { %2290 = vmatpush3.msra.mxu0 %v2611_v0  ;;  %2297 = vmatprep.mubr.msk.f32.mxu0 %vm2547_vm1, %v2546_v2 }
 0x573   :  { %2291 = vmatprep.subr.mxu0 %v2546_v2 }
 0x574   :  { %2292 = vmatpush3.msra.mxu0 %v2623_v3 }
 0x575   :  { %2293 = vmatprep.subr.mxu0 %v2546_v2 }
 0x576   :  { %2294 = vmatpush3.msra.mxu0 %v2637_v5 }
 0x577   :  { %2295 = vmatprep.subr.mxu0 %v2546_v2 }
 0x578   :  { %2296 = vmatpush3.msra.mxu0 %v2651_v7 }
 0x579   :  { %2311 = vmatprep.subr.mxu0 %v2546_v2 }
 0x631   :  { %v472_v55 = vpop.f32.mrf.mxu0 }
 0x632   :  { %v546_v56 = vadd.f32 %v545_v52, %v472_v55 }
 0x633   :  { %v2277_v57 = vpop.f32.mrf.mxu0 }
 0x634   :  { %v549_v58 = vadd.f32 %v2698_v11, %v546_v56  ;;  %v2121_v57 = vld [vmem:[%s3211_s0 + $0xa] sm:$0x3] }
 0x635   :  { %2353 = vmatmul.mubr.msk.f32.vlgmr.msra.gmra.mxu1 %vm40_vm0, %v2121_v57 }
 0x636   :  { %2422 = vtanh.f32 %v549_v58  ;;  %v2112_v60 = vmul.f32 -1.442695, %v549_v58  ;;  %2367 = vmatpush3.msra.mxu1 %v2616_v1  ;;  %2374 = vmatprep.mubr.msk.f32.mxu1 %vm2547_vm1, %v2546_v2 }
 0x637   :  { %2368 = vmatprep.subr.mxu1 %v2546_v2 }
 0x638   :  { %2424 = vpow2.f32 %v2112_v60  ;;  %2369 = vmatpush3.msra.mxu1 %v2628_v4 }
 0x639   :  { %2370 = vmatprep.subr.mxu1 %v2546_v2 }
 0x63a   :  { %2371 = vmatpush3.msra.mxu1 %v2642_v6 }
 0x63b   :  { %2372 = vmatprep.subr.mxu1 %v2546_v2 }
 0x63c   :  { %2373 = vmatpush3.msra.mxu1 %v2658_v8 }
 0x63d   :  { %2388 = vmatprep.subr.mxu1 %v2546_v2 }
 0x643   :  { %v2423_v59 = vpop.eup %2422 }
 0x644   :  { %559 = vrot.lane.b32.xlu0 %v2423_v59, %s2548_s11 }
 0x645   :  { %v2425_v61 = vpop.eup %2424 }
 0x646   :  { %v553_v62 = vadd.f32 1.0, %v2425_v61 }
 0x648   :  { %2426 = vrcp.f32 %v553_v62 }
 0x655   :  { %v2427_v63 = vpop.eup %2426 }
 0x656   :  { %v557_v12 = vmul.f32 %v2427_v63, %v389_v47 }
 0x6b6   :  { %v560_v9 = vpop.permute.xlu0 %559 }
 0x6b7   :  { %v562_v10 = vmul.f32 %v2427_v63, %v560_v9 }
 0x6b9   :  { %564 = vrot.lane.b32.xlu1 %v562_v10, %s2549_s3 }
 0x6f5   :  { %v1079_v61 = vpop.f32.mrf.mxu1 }
 0x6f7   :  { %v2354_v62 = vpop.f32.mrf.mxu1 }
 0x6f8   :  { %v2923_v62 = vld [vmem:[%s3215_s4 + $0x48] sm:$0xff] }
 0x72b   :  { %v565_v13 = vpop.permute.xlu1 %564 }
 0x72c   :  { %v567_v14 = vadd.f32 %v565_v13, %v557_v12 }
 0x72e   :  { %2428 = vtanh.f32 %v567_v14 }
 0x73b   :  { %v2429_v16 = vpop.eup %2428 }
 0x73c   :  { %570 = vrot.lane.b32.xlu0 %v2429_v16, %s2548_s11 }
 0x7ae   :  { %v571_v17 = vpop.permute.xlu0 %570 }
 0x7af   :  { %v573_v18 = vmul.f32 %v2427_v63, %v571_v17 }
 0x7b1   :  { %575 = vrot.lane.b32.xlu1 %v573_v18, %s2549_s3 }
 0x823   :  { %v576_v21 = vpop.permute.xlu1 %575 }
 0x824   :  { %579 = vst.msk [vmem:[#allocation2 + $0x4] sm:$0x3] %vm222_vm2, %v576_v21  ;;  %2298 = vmatmul.mubr.msk.f32.vlgmr.msra.gmra.mxu0 %vm40_vm0, %v576_v21 }
 0x825   :  { %2312 = vmatpush3.msra.mxu0 %v2611_v0  ;;  %2319 = vmatprep.mubr.msk.f32.mxu0 %vm2547_vm1, %v2546_v2 }
 0x826   :  { %2313 = vmatprep.subr.mxu0 %v2546_v2 }
 0x827   :  { %2314 = vmatpush3.msra.mxu0 %v2623_v3 }
 0x828   :  { %2315 = vmatprep.subr.mxu0 %v2546_v2 }
 0x829   :  { %2316 = vmatpush3.msra.mxu0 %v2637_v5 }
 0x82a   :  { %2317 = vmatprep.subr.mxu0 %v2546_v2 }
 0x82b   :  { %2318 = vmatpush3.msra.mxu0 %v2651_v7 }
 0x82c   :  { %2333 = vmatprep.subr.mxu0 %v2546_v2 }
 0x8e4   :  { %v650_v22 = vpop.f32.mrf.mxu0 }
 0x8e5   :  { %v724_v23 = vadd.f32 %v723_v19, %v650_v22 }
 0x8e6   :  { %v2299_v24 = vpop.f32.mrf.mxu0 }
 0x8e7   :  { %v727_v25 = vadd.f32 %v2698_v11, %v724_v23  ;;  %v2125_v24 = vld [vmem:[%s3211_s0 + $0xc] sm:$0x3] }
 0x8e8   :  { %2375 = vmatmul.mubr.msk.f32.vlgmr.msra.gmra.mxu1 %vm40_vm0, %v2125_v24 }
 0x8e9   :  { %2430 = vtanh.f32 %v727_v25  ;;  %v2116_v27 = vmul.f32 -1.442695, %v727_v25  ;;  %2389 = vmatpush3.msra.mxu1 %v2616_v1  ;;  %2396 = vmatprep.mubr.msk.f32.mxu1 %vm2547_vm1, %v2546_v2 }
 0x8ea   :  { %2390 = vmatprep.subr.mxu1 %v2546_v2 }
 0x8eb   :  { %2432 = vpow2.f32 %v2116_v27  ;;  %2391 = vmatpush3.msra.mxu1 %v2628_v4 }
 0x8ec   :  { %2392 = vmatprep.subr.mxu1 %v2546_v2 }
 0x8ed   :  { %2393 = vmatpush3.msra.mxu1 %v2642_v6 }
 0x8ee   :  { %2394 = vmatprep.subr.mxu1 %v2546_v2 }
 0x8ef   :  { %2395 = vmatpush3.msra.mxu1 %v2658_v8 }
 0x8f6   :  { %v2431_v26 = vpop.eup %2430 }
 0x8f7   :  { %737 = vrot.lane.b32.xlu0 %v2431_v26, %s2548_s11 }
 0x8f8   :  { %v2433_v28 = vpop.eup %2432 }
 0x8f9   :  { %v731_v29 = vadd.f32 1.0, %v2433_v28 }
 0x8fb   :  { %2434 = vrcp.f32 %v731_v29 }
 0x908   :  { %v2435_v30 = vpop.eup %2434 }
 0x909   :  { %v735_v33 = vmul.f32 %v2435_v30, %v567_v14 }
 0x969   :  { %v738_v31 = vpop.permute.xlu0 %737 }
 0x96a   :  { %v740_v32 = vmul.f32 %v2435_v30, %v738_v31 }
 0x96c   :  { %742 = vrot.lane.b32.xlu1 %v740_v32, %s2549_s3 }
 0x9a8   :  { %v1257_v27 = vpop.f32.mrf.mxu1 }
 0x9aa   :  { %v2376_v28 = vpop.f32.mrf.mxu1 }
 0x9de   :  { %v743_v34 = vpop.permute.xlu1 %742 }
 0x9df   :  { %v745_v35 = vadd.f32 %v743_v34, %v735_v33 }
 0x9e1   :  { %2436 = vtanh.f32 %v745_v35 }
 0x9ee   :  { %v2437_v37 = vpop.eup %2436 }
 0x9ef   :  { %748 = vrot.lane.b32.xlu0 %v2437_v37, %s2548_s11  ;;  %v2129_v37 = vld [vmem:[%s3211_s0 + $0xe] sm:$0x3] }
 0x9f0   :  { %2397 = vmatmul.mubr.msk.f32.vlgmr.msra.gmra.mxu1 %vm40_vm0, %v2129_v37 }
 0x9f1   :  { %1688 = vmatprep.mubr.f32.mxu1 %v2546_v2 }
 0xa61   :  { %v749_v38 = vpop.permute.xlu0 %748 }
 0xa62   :  { %v751_v39 = vmul.f32 %v2435_v30, %v749_v38 }
 0xa64   :  { %753 = vrot.lane.b32.xlu1 %v751_v39, %s2549_s3 }
 0xab0   :  { %v1435_v41 = vpop.f32.mrf.mxu1 }
 0xad6   :  { %v754_v42 = vpop.permute.xlu1 %753 }
 0xad7   :  { %757 = vst.msk [vmem:[#allocation2 + $0x6] sm:$0x3] %vm222_vm2, %v754_v42  ;;  %2320 = vmatmul.mubr.msk.f32.vlgmr.msra.gmra.mxu0 %vm40_vm0, %v754_v42  ;;  %v2398_v42 = vpop.f32.mrf.mxu1 }
 0xad8   :  { %2334 = vmatpush3.msra.mxu0 %v2611_v0  ;;  %2341 = vmatprep.mubr.msk.f32.mxu0 %vm2547_vm1, %v2546_v2 }
 0xad9   :  { %2335 = vmatprep.subr.mxu0 %v2546_v2 }
 0xada   :  { %2336 = vmatpush3.msra.mxu0 %v2623_v3 }
 0xadb   :  { %2337 = vmatprep.subr.mxu0 %v2546_v2 }
 0xadc   :  { %2338 = vmatpush3.msra.mxu0 %v2637_v5 }
 0xadd   :  { %2339 = vmatprep.subr.mxu0 %v2546_v2 }
 0xade   :  { %2340 = vmatpush3.msra.mxu0 %v2651_v7 }
 0xadf   :  { %2355 = vmatprep.subr.mxu0 %v2546_v2 }
 0xb97   :  { %v828_v43 = vpop.f32.mrf.mxu0 }
 0xb98   :  { %v902_v44 = vadd.f32 %v901_v40, %v828_v43 }
 0xb99   :  { %v2321_v45 = vpop.f32.mrf.mxu0 }
 0xb9a   :  { %v905_v46 = vadd.f32 %v2698_v11, %v902_v44 }
 0xb9c   :  { %2438 = vtanh.f32 %v905_v46  ;;  %v2120_v48 = vmul.f32 -1.442695, %v905_v46 }
 0xb9e   :  { %2440 = vpow2.f32 %v2120_v48 }
 0xba9   :  { %v2439_v47 = vpop.eup %2438 }
 0xbaa   :  { %915 = vrot.lane.b32.xlu0 %v2439_v47, %s2548_s11 }
 0xbab   :  { %v2441_v49 = vpop.eup %2440 }
 0xbac   :  { %v909_v50 = vadd.f32 1.0, %v2441_v49 }
 0xbae   :  { %2442 = vrcp.f32 %v909_v50 }
 0xbbb   :  { %v2443_v51 = vpop.eup %2442 }
 0xbbc   :  { %v913_v54 = vmul.f32 %v2443_v51, %v745_v35 }
 0xc1c   :  { %v916_v52 = vpop.permute.xlu0 %915 }
 0xc1d   :  { %v918_v53 = vmul.f32 %v2443_v51, %v916_v52 }
 0xc1f   :  { %920 = vrot.lane.b32.xlu1 %v918_v53, %s2549_s3 }
 0xc91   :  { %v921_v55 = vpop.permute.xlu1 %920 }
 0xc92   :  { %v923_v56 = vadd.f32 %v921_v55, %v913_v54 }
 0xc94   :  { %2444 = vtanh.f32 %v923_v56 }
 0xca1   :  { %v2445_v58 = vpop.eup %2444 }
 0xca2   :  { %926 = vrot.lane.b32.xlu0 %v2445_v58, %s2548_s11  ;;  %v1489_v58 = vld [vmem:[%s3215_s4 + $0x68] sm:$0xff] }
 0xd14   :  { %v927_v59 = vpop.permute.xlu0 %926 }
 0xd15   :  { %v929_v60 = vmul.f32 %v2443_v51, %v927_v59  ;;  %v1491_v59 = vld [vmem:[%s3215_s4 + $0x78] sm:$0xff] }
 0xd16   :  { %1648 = vmatprep.subr.mxu1 %v1491_v59 }
 0xd17   :  { %931 = vrot.lane.b32.xlu1 %v929_v60, %s2549_s3  ;;  %v2913_v60 = vld [vmem:[%s3215_s4 + $0x60] sm:$0xff] }
 0xd89   :  { %v932_v63 = vpop.permute.xlu1 %931 }
 0xd8a   :  { %935 = vst.msk [vmem:[#allocation2 + $0x8] sm:$0x3] %vm222_vm2, %v932_v63  ;;  %2342 = vmatmul.mubr.msk.f32.vlgmr.msra.gmra.mxu0 %vm40_vm0, %v932_v63  ;;  %v2928_v63 = vld [vmem:[%s3215_s4 + $0x58] sm:$0xff] }
 0xd8b   :  { %2356 = vmatpush3.msra.mxu0 %v2611_v0  ;;  %2363 = vmatprep.mubr.msk.f32.mxu0 %vm2547_vm1, %v2546_v2 }
 0xd8c   :  { %2357 = vmatprep.subr.mxu0 %v2546_v2 }
 0xd8d   :  { %2358 = vmatpush3.msra.mxu0 %v2623_v3 }
 0xd8e   :  { %2359 = vmatprep.subr.mxu0 %v2546_v2 }
 0xd8f   :  { %2360 = vmatpush3.msra.mxu0 %v2637_v5 }
 0xd90   :  { %2361 = vmatprep.subr.mxu0 %v2546_v2 }
 0xd91   :  { %2362 = vmatpush3.msra.mxu0 %v2651_v7 }
 0xd92   :  { %2377 = vmatprep.subr.mxu0 %v2546_v2 }
 0xe4a   :  { %v1006_v9 = vpop.f32.mrf.mxu0 }
 0xe4b   :  { %v1080_v10 = vadd.f32 %v1079_v61, %v1006_v9  ;;  %v2918_v61 = vld [vmem:[%s3215_s4 + $0x70] sm:$0xff]  ;;  %v2935_v9 = vld [vmem:[%s3215_s4 + $0x40] sm:$0xff] }
 0xe4c   :  { %v2343_v12 = vpop.f32.mrf.mxu0  ;;  %1649 = vmatpush1.msra.mxu1 %v2918_v61 }
 0xe4d   :  { %v1083_v13 = vadd.f32 %v2698_v11, %v1080_v10  ;;  %v2940_v10 = vld [vmem:[%s3215_s4 + $0x50] sm:$0xff]  ;;  %v2945_v12 = vld [vmem:[%s3215_s4 + $0x28] sm:$0xff]  ;;  %1650 = vmatprep.subr.mxu1 %v2928_v63 }
 0xe4e   :  { %1651 = vmatpush1.msra.mxu1 %v2940_v10 }
 0xe4f   :  { %2446 = vtanh.f32 %v1083_v13  ;;  %v2124_v15 = vmul.f32 -1.442695, %v1083_v13  ;;  %v2952_v13 = vld [vmem:[%s3215_s4 + $0x38] sm:$0xff] }
 0xe50   :  { %1652 = vmatprep.subr.mxu1 %v2952_v13 }
 0xe51   :  { %2448 = vpow2.f32 %v2124_v15  ;;  %v2962_v15 = vld [vmem:[%s3215_s4 + $0x30] sm:$0xff] }
 0xe52   :  { %1653 = vmatpush1.msra.mxu1 %v2962_v15 }
 0xe5c   :  { %v2447_v14 = vpop.eup %2446 }
 0xe5d   :  { %1093 = vrot.lane.b32.xlu0 %v2447_v14, %s2548_s11  ;;  %v2957_v14 = vld [vmem:[%s3215_s4 + $0x20] sm:$0xff] }
 0xe5e   :  { %v2449_v16 = vpop.eup %2448 }
 0xe5f   :  { %v1087_v17 = vadd.f32 1.0, %v2449_v16  ;;  %v2969_v16 = vld [vmem:[%s3215_s4 + $0x8] sm:$0xff] }
 0xe61   :  { %2450 = vrcp.f32 %v1087_v17  ;;  %v2974_v17 = vld [vmem:[%s3215_s4 + $0x18] sm:$0xff] }
 0xe62   :  { %1654 = vmatprep.subr.mxu1 %v2974_v17 }
 0xe6e   :  { %v2451_v18 = vpop.eup %2450 }
 0xe6f   :  { %v1091_v21 = vmul.f32 %v2451_v18, %v923_v56 }
 0xecf   :  { %v1094_v19 = vpop.permute.xlu0 %1093 }
 0xed0   :  { %v1096_v20 = vmul.f32 %v2451_v18, %v1094_v19  ;;  %v2986_v19 = vld [vmem:[%s3215_s4 + $0x10] sm:$0xff] }
 0xed1   :  { %1655 = vmatpush1.msra.mxu1 %v2986_v19 }
 0xed2   :  { %1098 = vrot.lane.b32.xlu1 %v1096_v20, %s2549_s3  ;;  %1910 = vmatprep.subr.mxu1 %v1491_v59 }
 0xf44   :  { %v1099_v22 = vpop.permute.xlu1 %1098 }
 0xf45   :  { %v1101_v23 = vadd.f32 %v1099_v22, %v1091_v21  ;;  %v1494_v22 = vld [vmem:[#allocation2 + $0x2] sm:$0x3] }
 0xf47   :  { %2452 = vtanh.f32 %v1101_v23 }
 0xf54   :  { %v2453_v25 = vpop.eup %2452 }
 0xf55   :  { %1104 = vrot.lane.b32.xlu0 %v2453_v25, %s2548_s11  ;;  %v1496_v25 = vld [vmem:[#allocation2 + $0x6] sm:$0x3] }
 0xfc7   :  { %v1105_v26 = vpop.permute.xlu0 %1104 }
 0xfc8   :  { %v1107_v1 = vmul.f32 %v2451_v18, %v1105_v26  ;;  %v2981_v18 = vld [vmem:[%s3215_s4] sm:$0xff]  ;;  %v1497_v26 = vld [vmem:[#allocation2 + $0x8] sm:$0x3] }
 0xfca   :  { %1109 = vrot.lane.b32.xlu1 %v1107_v1, %s2549_s3  ;;  %v1530_v1 = vrot.slane %v1494_v22, 7 }
0x103c   :  { %v1110_v29 = vpop.permute.xlu1 %1109 }
0x103d   :  { %1113 = vst.msk [vmem:[#allocation2 + $0xa] sm:$0x3] %vm222_vm2, %v1110_v29  ;;  %2364 = vmatmul.mubr.msk.f32.vlgmr.msra.gmra.mxu0 %vm40_vm0, %v1110_v29 }
0x103e   :  { %2378 = vmatpush3.msra.mxu0 %v2611_v0  ;;  %2385 = vmatprep.mubr.msk.f32.mxu0 %vm2547_vm1, %v2546_v2 }
0x103f   :  { %2379 = vmatprep.subr.mxu0 %v2546_v2 }
0x1040   :  { %2380 = vmatpush3.msra.mxu0 %v2623_v3 }
0x1041   :  { %2381 = vmatprep.subr.mxu0 %v2546_v2 }
0x1042   :  { %2382 = vmatpush3.msra.mxu0 %v2637_v5 }
0x1043   :  { %2383 = vmatprep.subr.mxu0 %v2546_v2 }
0x1044   :  { %2384 = vmatpush3.msra.mxu0 %v2651_v7 }
0x1045   :  { %1577 = vmatprep.subr.mxu0 %v1489_v58 }
0x10fd   :  { %v1184_v4 = vpop.f32.mrf.mxu0 }
0x10fe   :  { %v1258_v6 = vadd.f32 %v1257_v27, %v1184_v4  ;;  %v1498_v27 = vld [vmem:[#allocation2 + $0xa] sm:$0x3]  ;;  %v1536_v4 = vrot.slane %v1496_v25, 5 }
0x10ff   :  { %v2365_v8 = vpop.f32.mrf.mxu0  ;;  %v1807_v42 = vrot.slane %v1498_v27, 4 }
0x1100   :  { %v1261_v0 = vadd.f32 %v2698_v11, %v1258_v6  ;;  %v1493_v6 = vld [vmem:[#allocation2] sm:$0x3]  ;;  %v1539_v8 = vrot.slane %v1497_v26, 4 }
0x1102   :  { %2454 = vtanh.f32 %v1261_v0  ;;  %v2128_v31 = vmul.f32 -1.442695, %v1261_v0  ;;  %v1532_v0 = vsel %vm1531_vm4, %v1530_v1, %v1493_v6 }
0x1104   :  { %2456 = vpow2.f32 %v2128_v31 }
0x110f   :  { %v2455_v30 = vpop.eup %2454 }
0x1110   :  { %1271 = vrot.lane.b32.xlu0 %v2455_v30, %s2548_s11  ;;  %v1542_v30 = vrot.slane %v1498_v27, 3 }
0x1111   :  { %v2457_v3 = vpop.eup %2456 }
0x1112   :  { %v1265_v32 = vadd.f32 1.0, %v2457_v3 }
0x1114   :  { %2458 = vrcp.f32 %v1265_v32 }
0x1121   :  { %v2459_v33 = vpop.eup %2458 }
0x1122   :  { %v1269_v7 = vmul.f32 %v2459_v33, %v1101_v23  ;;  %v1495_v23 = vld [vmem:[#allocation2 + $0x4] sm:$0x3] }
0x1123   :  { %v1533_v28 = vrot.slane %v1495_v23, 6  ;;  %v1801_v37 = vrot.slane %v1495_v23, 7 }
0x1125   :  { %v1535_v31 = vsel %vm1534_vm3, %v1533_v28, %v1532_v0 }
0x1126   :  { %v1538_v32 = vsel %vm1537_vm5, %v1536_v4, %v1535_v31 }
0x1182   :  { %v1272_v5 = vpop.permute.xlu0 %1271 }
0x1183   :  { %v1274_v34 = vmul.f32 %v2459_v33, %v1272_v5  ;;  %v1541_v5 = vsel %vm1540_vm6, %v1539_v8, %v1538_v32 }
0x1185   :  { %1276 = vrot.lane.b32.xlu1 %v1274_v34, %s2549_s3  ;;  %v1544_v34 = vsel %vm1543_vm7, %v1542_v30, %v1541_v5 }
0x11f7   :  { %v1277_v35 = vpop.permute.xlu1 %1276 }
0x11f8   :  { %v1279_v36 = vadd.f32 %v1277_v35, %v1269_v7 }
0x11fa   :  { %2460 = vtanh.f32 %v1279_v36 }
0x1207   :  { %v2461_v38 = vpop.eup %2460 }
0x1208   :  { %1282 = vrot.lane.b32.xlu0 %v2461_v38, %s2548_s11  ;;  %v1799_v38 = vrot.slane %v1493_v6, 1 }
0x127a   :  { %v1283_v39 = vpop.permute.xlu0 %1282 }
0x127b   :  { %v1285_v40 = vmul.f32 %v2459_v33, %v1283_v39  ;;  %v1803_v39 = vrot.slane %v1496_v25, 6 }
0x127d   :  { %1287 = vrot.lane.b32.xlu1 %v1285_v40, %s2549_s3  ;;  %v1805_v40 = vrot.slane %v1497_v26, 5 }
0x12ef   :  { %v1288_v43 = vpop.permute.xlu1 %1287 }
0x12f0   :  { %1291 = vst.msk [vmem:[#allocation2 + $0xc] sm:$0x3] %vm222_vm2, %v1288_v43  ;;  %2386 = vmatmul.mubr.msk.f32.vlgmr.msra.gmra.mxu0 %vm40_vm0, %v1288_v43 }
0x12f1   :  { %1617 = vmatprep.mubr.f32.mxu0 %v2546_v2  ;;  %1578 = vmatpush1.msra.mxu0 %v2913_v60 }
0x12f2   :  { %1579 = vmatprep.subr.mxu0 %v2923_v62 }
0x12f3   :  { %1580 = vmatpush1.msra.mxu0 %v2935_v9 }
0x12f4   :  { %1581 = vmatprep.subr.mxu0 %v2945_v12 }
0x12f5   :  { %1582 = vmatpush1.msra.mxu0 %v2957_v14 }
0x12f6   :  { %1583 = vmatprep.subr.mxu0 %v2969_v16 }
0x12f7   :  { %1584 = vmatpush1.msra.mxu0 %v2981_v18  ;;  %v1499_v29 = vld [vmem:[#allocation2 + $0xc] sm:$0x3] }
0x12f8   :  { %1839 = vmatprep.subr.mxu0 %v1489_v58  ;;  %v1545_v3 = vrot.slane %v1499_v29, 2 }
0x12fa   :  { %v1547_v35 = vsel %vm1546_vm8, %v1545_v3, %v1544_v34 }
0x13b0   :  { %v1362_v44 = vpop.f32.mrf.mxu0 }
0x13b1   :  { %v1436_v45 = vadd.f32 %v1435_v41, %v1362_v44  ;;  %v1800_v41 = vsel %vm1531_vm4, %v1494_v22, %v1799_v38  ;;  %v1809_v44 = vrot.slane %v1499_v29, 3 }
0x13b2   :  { %v2387_v46 = vpop.f32.mrf.mxu0  ;;  %v1802_v43 = vsel %vm1534_vm3, %v1801_v37, %v1800_v41 }
0x13b3   :  { %v1439_v47 = vadd.f32 %v2698_v11, %v1436_v45  ;;  %v1804_v45 = vsel %vm1537_vm5, %v1803_v39, %v1802_v43 }
0x13b5   :  { %2462 = vtanh.f32 %v1439_v47  ;;  %v2132_v49 = vmul.f32 -1.442695, %v1439_v47  ;;  %v1806_v47 = vsel %vm1540_vm6, %v1805_v40, %v1804_v45 }
0x13b7   :  { %2464 = vpow2.f32 %v2132_v49 }
0x13c2   :  { %v2463_v48 = vpop.eup %2462 }
0x13c3   :  { %1449 = vrot.lane.b32.xlu0 %v2463_v48, %s2548_s11  ;;  %v1808_v48 = vsel %vm1543_vm7, %v1807_v42, %v1806_v47 }
0x13c4   :  { %v2465_v50 = vpop.eup %2464  ;;  %v1810_v49 = vsel %vm1546_vm8, %v1809_v44, %v1808_v48 }
0x13c5   :  { %v1443_v51 = vadd.f32 1.0, %v2465_v50 }
0x13c7   :  { %2466 = vrcp.f32 %v1443_v51  ;;  %v1502_v51 = vlaneseq }
0x13d4   :  { %v2467_v52 = vpop.eup %2466 }
0x13d5   :  { %v1447_v55 = vmul.f32 %v2467_v52, %v1279_v36 }
0x1435   :  { %v1450_v53 = vpop.permute.xlu0 %1449 }
0x1436   :  { %v1452_v54 = vmul.f32 %v2467_v52, %v1450_v53 }
0x1438   :  { %1454 = vrot.lane.b32.xlu1 %v1452_v54, %s2549_s3  ;;  %v3037_v54 = vld [vmem:[%s3216_s5] sm:$0xf] }
0x14aa   :  { %v1455_v56 = vpop.permute.xlu1 %1454 }
0x14ab   :  { %v2900_v57 = vadd.f32 %v1455_v56, %v1447_v55 }
0x14ad   :  { %2468 = vtanh.f32 %v2900_v57 }
0x14ba   :  { %v2469_v11 = vpop.eup %2468 }
0x14bb   :  { %1460 = vrot.lane.b32.xlu0 %v2469_v11, %s2548_s11 }
0x152d   :  { %v1461_v20 = vpop.permute.xlu0 %1460 }
0x152e   :  { %v1463_v21 = vmul.f32 %v2467_v52, %v1461_v20  ;;  %v3031_v52 = vshrl.u32 %v1502_v51, 7 }
0x1530   :  { %1465 = vrot.lane.b32.xlu1 %v1463_v21, %s2549_s3  ;;  %v1504_v53 = vsub.s32 0, %v3031_v52  ;;  %v1516_v6 = vsub.s32 3, %v3031_v52  ;;  %v1512_v34 = vsub.s32 2, %v3031_v52 }
0x1532   :  { %v1505_v55 = vrot.slane %v3037_v54, %v1504_v53  ;;  %v1513_v40 = vrot.slane %v3037_v54, %v1512_v34 }
0x15a2   :  { %v1466_v24 = vpop.permute.xlu1 %1465 }
0x15a3   :  { %1469 = vst.msk [vmem:[#allocation2 + $0xe] sm:$0x3] %vm222_vm2, %v1466_v24  ;;  %1470 = vst.msk [vmem:[#allocation3] sm:$0x3] %vm222_vm2, %v1466_v24 }
0x15aa   :  { %v1500_v33 = vld [vmem:[#allocation2 + $0xe] sm:$0x3] }
0x15ab   :  { %v1548_v7 = vrot.slane %v1500_v33, 1  ;;  %v1811_v46 = vrot.slane %v1500_v33, 2  ;;  %v3088_v33 = vrot.slane %v3037_v54, %v1516_v6 }
0x15ad   :  { %v1550_v36 = vsel %vm1549_vm9, %v1548_v7, %v1547_v35  ;;  %v1812_v50 = vsel %vm1549_vm9, %v1811_v46, %v1810_v49 }
0x15ae   :  { %2133 = vmatmul.mubr.msk.f32.vlgmr.msra.gmra.mxu0 %vm40_vm0, %v1550_v36  ;;  %2134 = vmatmul.mubr.msk.f32.vlgmr.msra.gmra.mxu1 %vm40_vm0, %v1550_v36 }
0x15af   :  { %1840 = vmatpush1.msra.mxu0 %v2913_v60  ;;  %1911 = vmatpush1.msra.mxu1 %v2918_v61  ;;  %v1508_v61 = vsub.s32 1, %v3031_v52 }
0x15b0   :  { %1841 = vmatprep.subr.mxu0 %v2923_v62  ;;  %1912 = vmatprep.subr.mxu1 %v2928_v63 }
0x15b1   :  { %1842 = vmatpush1.msra.mxu0 %v2935_v9  ;;  %1913 = vmatpush1.msra.mxu1 %v2940_v10  ;;  %v1509_v63 = vrot.slane %v3037_v54, %v1508_v61 }
0x15b2   :  { %1843 = vmatprep.subr.mxu0 %v2945_v12  ;;  %1914 = vmatprep.subr.mxu1 %v2952_v13 }
0x15b3   :  { %1844 = vmatpush1.msra.mxu0 %v2957_v14  ;;  %1915 = vmatpush1.msra.mxu1 %v2962_v15 }
0x15b4   :  { %1845 = vmatprep.subr.mxu0 %v2969_v16  ;;  %1916 = vmatprep.subr.mxu1 %v2974_v17 }
0x15b5   :  { %1846 = vmatpush1.msra.mxu0 %v2981_v18  ;;  %1879 = vmatprep.mubr.f32.mxu0 %v2546_v2 }
0x15b6   :  { %1917 = vmatpush1.msra.mxu1 %v2986_v19  ;;  %1950 = vmatprep.mubr.f32.mxu1 %v2546_v2 }
0x15b7   :  { %2135 = vmatmul.mubr.msk.f32.vlgmr.msra.gmra.mxu0 %vm40_vm0, %v1812_v50  ;;  %2136 = vmatmul.mubr.msk.f32.vlgmr.msra.gmra.mxu1 %vm40_vm0, %v1812_v50 }
0x166e   :  { %v1619_v56 = vpop.f32.mrf.mxu0  ;;  %v1690_v30 = vpop.f32.mrf.mxu1 }
0x166f   :  { %v3040_v2 = vadd.f32 %v1619_v56, %v1505_v55  ;;  %v1691_v45 = vadd.f32 %v1690_v30, %v1513_v40 }
0x1670   :  { %v1621_v11 = vpop.f32.mrf.mxu0  ;;  %v1692_v7 = vpop.f32.mrf.mxu1 }
0x1671   :  { %1696 = vrot.lane.b32.xlu0 %v3040_v2, %s2550_s15  ;;  %v3059_v13 = vadd.f32 %v1621_v11, %v1509_v63  ;;  %v1693_v37 = vadd.f32 %v1692_v7, %v3088_v33  ;;  %v1784_v47 = vmul.f32 1.442695, %v1691_v45 }
0x1673   :  { %v1786_v43 = vmul.f32 1.442695, %v1693_v37 }
0x1675   :  { %1700 = vrot.lane.b32.xlu0 %v3040_v2, %s2548_s11 }
0x1677   :  { %v1881_v58 = vpop.f32.mrf.mxu0  ;;  %v1952_v52 = vpop.f32.mrf.mxu1 }
0x1678   :  { %v3046_v59 = vadd.f32 %v1881_v58, %v1505_v55  ;;  %v1953_v53 = vadd.f32 %v1952_v52, %v1513_v40 }
0x1679   :  { %1704 = vrot.lane.b32.xlu0 %v3040_v2, %s2549_s3  ;;  %v1883_v19 = vpop.f32.mrf.mxu0 }
0x167a   :  { %1958 = vrot.lane.b32.xlu1 %v3046_v59, %s2550_s15  ;;  %v3069_v22 = vadd.f32 %v1883_v19, %v1509_v63 }
0x167e   :  { %1962 = vrot.lane.b32.xlu1 %v3046_v59, %s2548_s11 }
0x1682   :  { %1966 = vrot.lane.b32.xlu1 %v3046_v59, %s2549_s3 }
0x16e3   :  { %v1697_v60 = vpop.permute.xlu0 %1696 }
0x16e4   :  { %v1699_v9 = vmax.f32 %v3040_v2, %v1697_v60 }
0x16e7   :  { %v1701_v62 = vpop.permute.xlu0 %1700 }
0x16e8   :  { %v1703_v10 = vmax.f32 %v1699_v9, %v1701_v62 }
0x16eb   :  { %v1705_v12 = vpop.permute.xlu0 %1704 }
0x16ec   :  { %v1959_v14 = vpop.permute.xlu1 %1958  ;;  %v1707_v15 = vmax.f32 %v1703_v10, %v1705_v12 }
0x16ed   :  { %v1961_v18 = vmax.f32 %v3046_v59, %v1959_v14 }
0x16ee   :  { %v3062_v16 = vmax.f32 %v1707_v15, %v3059_v13 }
0x16f0   :  { %v1963_v17 = vpop.permute.xlu1 %1962  ;;  %1713 = vrot.lane.b32.xlu0 %v3062_v16, %s2549_s3  ;;  %v1731_v56 = vsub.f32 %v3059_v13, %v3062_v16 }
0x16f1   :  { %v1965_v20 = vmax.f32 %v1961_v18, %v1963_v17 }
0x16f2   :  { %v1732_v58 = vmul.f32 1.442695, %v1731_v56 }
0x16f4   :  { %v1967_v21 = vpop.permute.xlu1 %1966  ;;  %1719 = vrot.lane.b32.xlu0 %v3062_v16, %s2548_s11 }
0x16f5   :  { %v1969_v23 = vmax.f32 %v1965_v20, %v1967_v21  ;;  %v1954_v20 = vpop.f32.mrf.mxu1 }
0x16f7   :  { %v3072_v24 = vmax.f32 %v1969_v23, %v3069_v22 }
0x16f8   :  { %1725 = vrot.lane.b32.xlu0 %v3062_v16, %s2550_s15 }
0x16f9   :  { %1975 = vrot.lane.b32.xlu1 %v3072_v24, %s2549_s3  ;;  %v1971_v11 = vsub.f32 %v3046_v59, %v3072_v24  ;;  %v1993_v61 = vsub.f32 %v3069_v22, %v3072_v24 }
0x16fb   :  { %v1972_v60 = vmul.f32 1.442695, %v1971_v11  ;;  %v1994_v63 = vmul.f32 1.442695, %v1993_v61 }
0x16fd   :  { %1981 = vrot.lane.b32.xlu1 %v3072_v24, %s2548_s11 }
0x1701   :  { %1987 = vrot.lane.b32.xlu1 %v3072_v24, %s2550_s15  ;;  %v1955_v24 = vadd.f32 %v1954_v20, %v3088_v33 }
0x1762   :  { %v1714_v25 = vpop.permute.xlu0 %1713 }
0x1763   :  { %v1716_v26 = vsub.f32 %v3040_v2, %v1714_v25 }
0x1765   :  { %v1717_v1 = vmul.f32 1.442695, %v1716_v26 }
0x1766   :  { %v1720_v27 = vpop.permute.xlu0 %1719 }
0x1767   :  { %2470 = vpow2.f32 %v1717_v1  ;;  %v1722_v28 = vsub.f32 %v3040_v2, %v1720_v27 }
0x1769   :  { %v1723_v29 = vmul.f32 1.442695, %v1722_v28 }
0x176a   :  { %v1726_v4 = vpop.permute.xlu0 %1725 }
0x176b   :  { %2472 = vpow2.f32 %v1723_v29  ;;  %v1976_v8 = vpop.permute.xlu1 %1975  ;;  %v1728_v0 = vsub.f32 %v3040_v2, %v1726_v4  ;;  %v2048_v29 = vmul.f32 1.442695, %v1955_v24 }
0x176c   :  { %v1978_v31 = vsub.f32 %v3046_v59, %v1976_v8 }
0x176d   :  { %v1729_v3 = vmul.f32 1.442695, %v1728_v0 }
0x176e   :  { %v1979_v32 = vmul.f32 1.442695, %v1978_v31 }
0x176f   :  { %2474 = vpow2.f32 %v1729_v3  ;;  %v1982_v5 = vpop.permute.xlu1 %1981 }
0x1770   :  { %2476 = vpow2.f32 %v1979_v32  ;;  %v1984_v35 = vsub.f32 %v3046_v59, %v1982_v5  ;;  %v2046_v5 = vmul.f32 1.442695, %v1953_v53 }
0x1772   :  { %v1985_v36 = vmul.f32 1.442695, %v1984_v35 }
0x1773   :  { %v1988_v38 = vpop.permute.xlu1 %1987 }
0x1774   :  { %v3093_v39 = vpop.eup %2470  ;;  %2478 = vpow2.f32 %v1985_v36  ;;  %v1990_v41 = vsub.f32 %v3046_v59, %v1988_v38 }
0x1775   :  { %1735 = vrot.lane.b32.xlu0 %v3093_v39, %s2550_s15 }
0x1776   :  { %v1991_v42 = vmul.f32 1.442695, %v1990_v41 }
0x1778   :  { %v3099_v44 = vpop.eup %2472  ;;  %2480 = vpow2.f32 %v1991_v42 }
0x1779   :  { %1740 = vrot.lane.b32.xlu0 %v3099_v44, %s2548_s11  ;;  %2482 = vpow2.f32 %v1786_v43 }
0x177a   :  { %2484 = vpow2.f32 %v1784_v47 }
0x177c   :  { %v3103_v46 = vpop.eup %2474 }
0x177d   :  { %v3105_v48 = vpop.eup %2476  ;;  %1745 = vrot.lane.b32.xlu0 %v3103_v46, %s2549_s3 }
0x177e   :  { %1997 = vrot.lane.b32.xlu1 %v3105_v48, %s2550_s15 }
0x1781   :  { %v3111_v49 = vpop.eup %2478  ;;  %1472 = vrot.lane.b32.xlu0 %v2900_v57, %s2550_s15  ;;  %v1709_v57 = vsub.f32 %v3040_v2, %v3062_v16 }
0x1782   :  { %2002 = vrot.lane.b32.xlu1 %v3111_v49, %s2548_s11 }
0x1783   :  { %v1710_v55 = vmul.f32 1.442695, %v1709_v57 }
0x1785   :  { %v3117_v50 = vpop.eup %2480  ;;  %1777 = vrot.lane.b32.xlu0 %v1691_v45, %s2550_s15  ;;  %2486 = vpow2.f32 %v1710_v55 }
0x1786   :  { %2007 = vrot.lane.b32.xlu1 %v3117_v50, %s2549_s3  ;;  %v2483_v51 = vpop.eup %2482  ;;  %2488 = vpow2.f32 %v1732_v58 }
0x1787   :  { %v2485_v54 = vpop.eup %2484  ;;  %2490 = vpow2.f32 %v1972_v60 }
0x1788   :  { %2492 = vpow2.f32 %v1994_v63 }
0x1789   :  { %1792 = vrot.lane.b32.xlu0 %v2483_v51, %s2548_s11 }
0x178a   :  { %1775 = vrot.lane.b32.xlu1 %v3059_v13, %s2550_s15 }
0x178d   :  { %2038 = vrot.lane.b32.xlu0 %v1953_v53, %s2550_s15 }
0x178e   :  { %1790 = vrot.lane.b32.xlu1 %v2485_v54, %s2548_s11 }
0x1792   :  { %2036 = vrot.lane.b32.xlu1 %v3069_v22, %s2550_s15  ;;  %v2487_v9 = vpop.eup %2486 }
0x1793   :  { %v2489_v16 = vpop.eup %2488 }
0x1794   :  { %v2491_v18 = vpop.eup %2490 }
0x1795   :  { %v2493_v1 = vpop.eup %2492 }
0x17e7   :  { %v1736_v62 = vpop.permute.xlu0 %1735 }
0x17e8   :  { %v1738_v2 = vadd.f32 %v2487_v9, %v1736_v62 }
0x17eb   :  { %v1741_v10 = vpop.permute.xlu0 %1740 }
0x17ec   :  { %v1743_v12 = vadd.f32 %v1741_v10, %v1738_v2 }
0x17ef   :  { %v1746_v14 = vpop.permute.xlu0 %1745 }
0x17f0   :  { %v1998_v13 = vpop.permute.xlu1 %1997  ;;  %v1748_v15 = vadd.f32 %v1746_v14, %v1743_v12 }
0x17f1   :  { %v2000_v21 = vadd.f32 %v2491_v18, %v1998_v13 }
0x17f2   :  { %v1749_v17 = vadd.f32 %v2489_v16, %v1748_v15 }
0x17f3   :  { %v1473_v59 = vpop.permute.xlu0 %1472 }
0x17f4   :  { %2494 = vrcp.f32 %v1749_v17  ;;  %v2003_v19 = vpop.permute.xlu1 %2002  ;;  %1475 = vst.msk [vmem:[#allocation5] sm:$0x3] %vm222_vm2, %v1473_v59 }
0x17f5   :  { %v2005_v22 = vadd.f32 %v2003_v19, %v2000_v21 }
0x17f7   :  { %v1778_v23 = vpop.permute.xlu0 %1777 }
0x17f8   :  { %v2008_v25 = vpop.permute.xlu1 %2007  ;;  %1783 = vst.msk [vmem:[%s3218_s7 + $0x8] sm:$0xff] %vm40_vm0, %v1778_v23 }
0x17f9   :  { %v2010_v26 = vadd.f32 %v2008_v25, %v2005_v22 }
0x17fb   :  { %v2011_v27 = vadd.f32 %v2493_v1, %v2010_v26  ;;  %v1793_v28 = vpop.permute.xlu0 %1792 }
0x17fc   :  { %v1776_v4 = vpop.permute.xlu1 %1775  ;;  %1798 = vst.msk [vmem:[%s3219_s8 + $0x8] sm:$0xff] %vm40_vm0, %v1793_v28 }
0x17fd   :  { %2496 = vrcp.f32 %v2011_v27  ;;  %v1779_v6 = vsel %vm1769_vm10, %v1776_v4, %v1778_v23 }
0x17fe   :  { %1782 = vst [vmem:[%s3218_s7] sm:$0xff] %v1779_v6  ;;  %2498 = vpow2.f32 %v2048_v29 }
0x17ff   :  { %v2039_v8 = vpop.permute.xlu0 %2038  ;;  %2500 = vpow2.f32 %v2046_v5 }
0x1800   :  { %v1791_v0 = vpop.permute.xlu1 %1790  ;;  %2140 = vst.msk [vmem:[%s3218_s7 + $0x18] sm:$0xff] %vm40_vm0, %v2039_v8 }
0x1801   :  { %v2495_v30 = vpop.eup %2494  ;;  %v1794_v31 = vsel %vm1767_vm11, %v1791_v0, %v1793_v28 }
0x1802   :  { %v1765_v3 = vmul.f32 %v2495_v30, %v2489_v16  ;;  %1797 = vst [vmem:[%s3219_s8] sm:$0xff] %v1794_v31  ;;  %1753 = vrot.lane.b32.xlu0 %v2495_v30, %s2549_s3  ;;  %v1751_v32 = vmul.f32 %v2495_v30, %v2487_v9 }
0x1804   :  { %1772 = vst.msk [vmem:[%s3217_s6 + $0x8] sm:$0xff] %vm40_vm0, %v1765_v3  ;;  %v2037_v33 = vpop.permute.xlu1 %2036 }
0x1805   :  { %v2040_v34 = vsel %vm1769_vm10, %v2037_v33, %v2039_v8 }
0x1806   :  { %2139 = vst [vmem:[%s3218_s7 + $0x10] sm:$0xff] %v2040_v34  ;;  %1757 = vrot.lane.b32.xlu0 %v2495_v30, %s2548_s11 }
0x180a   :  { %v2497_v7 = vpop.eup %2496  ;;  %1761 = vrot.lane.b32.xlu0 %v2495_v30, %s2550_s15 }
0x180b   :  { %v2027_v35 = vmul.f32 %v2497_v7, %v2493_v1  ;;  %2015 = vrot.lane.b32.xlu1 %v2497_v7, %s2549_s3  ;;  %v2013_v36 = vmul.f32 %v2497_v7, %v2491_v18 }
0x180c   :  { %2513 = shalt.err (!%p2510_p4)
}
0x180d   :  { %2077 = dma.vmem_to_hbm [thread:$0]  %s2075_s29, 32, %s3220_s9, [#allocation4]   ;;  %v2499_v37 = vpop.eup %2498  ;;  %2138 = vst.msk [vmem:[%s3217_s6 + $0x18] sm:$0xff] %vm40_vm0, %v2027_v35 }
0x180e   :  { %s2522_s3 = scalar_lea.vmem %s2085_s1, 32  ;;  %p2527_p6 = scmp.lt.s32.totalorder %s2085_s1, %s2085_s1 }
0x180f   :  { %p2523_p5 = scmp.ne.s32.totalorder %s2085_s1, %s2522_s3  ;;  %p2528_p7 = scmp.lt.s32.totalorder %s2522_s3, %s2522_s3 }
0x1811   :  { %p2529_p8 = por %p2528_p7, %p2527_p6 }
0x1813   :  { %p2530_p9 = pnand %p2529_p8, %p2523_p5 }
0x1815   :  { %2533 = shalt.err (!%p2530_p9)
}
0x1816   :  { %2087 = dma.vmem_to_hbm [thread:$0]  %s2085_s1, 32, %s3221_s10, [#allocation6]   ;;  %2054 = vrot.lane.b32.xlu0 %v2499_v37, %s2548_s11  ;;  %2019 = vrot.lane.b32.xlu1 %v2497_v7, %s2548_s11  ;;  %v2501_v38 = vpop.eup %2500 }
0x181a   :  { %2023 = vrot.lane.b32.xlu1 %v2497_v7, %s2550_s15 }
0x181e   :  { %2052 = vrot.lane.b32.xlu1 %v2501_v38, %s2548_s11 }
0x1874   :  { %v1754_v40 = vpop.permute.xlu0 %1753 }
0x1875   :  { %v1756_v42 = vmul.f32 %v3093_v39, %v1754_v40 }
0x1877   :  { %v1766_v47 = vsel %vm40_vm0, %v1751_v32, %v1756_v42 }
0x1878   :  { %v1758_v41 = vpop.permute.xlu0 %1757 }
0x1879   :  { %v1760_v43 = vmul.f32 %v3099_v44, %v1758_v41 }
0x187b   :  { %v1768_v53 = vsel %vm1767_vm11, %v1766_v47, %v1760_v43 }
0x187c   :  { %v1762_v45 = vpop.permute.xlu0 %1761 }
0x187d   :  { %v2016_v51 = vpop.permute.xlu1 %2015  ;;  %v1764_v52 = vmul.f32 %v3103_v46, %v1762_v45 }
0x187e   :  { %v2018_v39 = vmul.f32 %v3105_v48, %v2016_v51 }
0x187f   :  { %v1770_v54 = vsel %vm1769_vm10, %v1768_v53, %v1764_v52 }
0x1880   :  { %1771 = vst [vmem:[%s3217_s6] sm:$0xff] %v1770_v54  ;;  %v2028_v56 = vsel %vm40_vm0, %v2013_v36, %v2018_v39 }
0x1888   :  { %v2055_v57 = vpop.permute.xlu0 %2054  ;;  %v2020_v55 = vpop.permute.xlu1 %2019 }
0x1889   :  { %2142 = vst.msk [vmem:[%s3219_s8 + $0x18] sm:$0xff] %vm40_vm0, %v2055_v57  ;;  %v2022_v44 = vmul.f32 %v3111_v49, %v2020_v55 }
0x188b   :  { %v2029_v58 = vsel %vm1767_vm11, %v2028_v56, %v2022_v44 }
0x188c   :  { %v2024_v46 = vpop.permute.xlu1 %2023 }
0x188d   :  { %v2026_v11 = vmul.f32 %v3117_v50, %v2024_v46 }
0x188f   :  { %v2030_v60 = vsel %vm1769_vm10, %v2029_v58, %v2026_v11 }
0x1890   :  { %2137 = vst [vmem:[%s3217_s6 + $0x10] sm:$0xff] %v2030_v60  ;;  %v2053_v61 = vpop.permute.xlu1 %2052 }
0x1891   :  { %v2056_v62 = vsel %vm1767_vm11, %v2053_v61, %v2055_v57 }
0x1892   :  { %2141 = vst [vmem:[%s3219_s8 + $0x10] sm:$0xff] %v2056_v62 }
0x1893   :  { %2542 = dma.done.wait [#allocation4], 32  }
0x1894   :  { %2543 = vsyncadd [#allocation4], 4294967264 }
0x1895   :  { %2544 = dma.done.wait [#allocation6], 32  }
0x1896   :  { %2545 = vsyncadd [#allocation6], 4294967264 }
0x1897   :  { %2100 = vsyncpa [#allocation4], 1 }
0x1898   :  { %2101 = vsyncpa [#allocation6], 1 }

</bundles_post_ra>
